<compile_context>
chip_gen: v7x
topology: tpu7x:2x2x1
jax: 0.10.0
libtpu: 0.0.40
codegen_flags: <defaults>
</compile_context>

<pallas_src>
import math
import functools

import numpy as np
import jax
import jax.numpy as jnp
from jax import lax
from jax.experimental import pallas as pl
from jax.experimental.pallas import tpu as pltpu


def _round_up(x, m):
    return (x + m - 1) // m * m


# ------------------------------ Pallas kernel ------------------------------ #
def _encoder_layer_kernel(x_ref,
                          wq_ref, bq_ref, wk_ref, bk_ref, wv_ref, bv_ref,
                          wo_ref, bo_ref,
                          g1_ref, be1_ref, w1_ref, b1_ref, w2_ref, b2_ref,
                          g2_ref, be2_ref,
                          o_ref, *, nhead, h_true, eps):
    """Grid = (batch, layer).  One step = one batch element through one layer.

    The output block (constant block index along the inner 'arbitrary' layer
    axis) is the VMEM-resident inter-layer carry; HBM writeback happens once.
    All weights are zero-padded to lane-dense shapes so padded lanes stay 0.
    """
    layer = pl.program_id(1)

    @pl.when(layer == 0)
    def _():
        o_ref[...] = x_ref[...]

    x = o_ref[...]                                    # (S, Hp) float32
    x_bf = x.astype(jnp.bfloat16)
    inv_h = jnp.float32(1.0 / h_true)

    def mm(a_bf16, w_bf16):                           # bf16 MXU, f32 accumulate
        return jnp.dot(a_bf16, w_bf16, preferred_element_type=jnp.float32)

    # --- multi-head self-attention (softmax scale folded into Wq/bq) ------- #
    attn = jnp.zeros_like(x)
    for h in range(nhead):                            # tiny static unroll, per-head weights pre-split
        q = mm(x_bf, wq_ref[h]) + bq_ref[h]           # (S, hdp) f32
        k = mm(x_bf, wk_ref[h]) + bk_ref[h]
        v = mm(x_bf, wv_ref[h]) + bv_ref[h]
        s = lax.dot_general(q.astype(jnp.bfloat16), k.astype(jnp.bfloat16),
                            (((1,), (1,)), ((), ())),             # q @ k^T
                            preferred_element_type=jnp.float32)   # (S, S)
        s = s - jnp.max(s, axis=-1, keepdims=True)
        p = jnp.exp(s)
        p = p * pl.reciprocal(jnp.sum(p, axis=-1, keepdims=True), approx=True)
        ctx = mm(p.astype(jnp.bfloat16), v.astype(jnp.bfloat16))  # (S, hdp)
        # concat(head outputs) @ Wo == sum_h ctx_h @ Wo_rows[h]
        attn = attn + mm(ctx.astype(jnp.bfloat16), wo_ref[h])
    attn = attn + bo_ref[...]

    # --- residual + LayerNorm 1 (true-H divisor, one-pass variance) -------- #
    y = x + attn
    mu = jnp.sum(y, axis=-1, keepdims=True) * inv_h
    var = jnp.sum(y * y, axis=-1, keepdims=True) * inv_h - mu * mu
    y = (y - mu) * lax.rsqrt(var + eps) * g1_ref[...] + be1_ref[...]

    # --- feed-forward (ReLU) ------------------------------------------------ #
    h1 = jnp.maximum(mm(y.astype(jnp.bfloat16), w1_ref[...]) + b1_ref[...], 0.0)
    h2 = mm(h1.astype(jnp.bfloat16), w2_ref[...]) + b2_ref[...]

    # --- residual + LayerNorm 2 --------------------------------------------- #
    z = y + h2
    mu2 = jnp.sum(z, axis=-1, keepdims=True) * inv_h
    var2 = jnp.sum(z * z, axis=-1, keepdims=True) * inv_h - mu2 * mu2
    z = (z - mu2) * lax.rsqrt(var2 + eps) * g2_ref[...] + be2_ref[...]

    o_ref[...] = z                                    # VMEM-resident carry for the next layer


# ------------------------------ pallas wrapper ------------------------------ #
def encoder_forward_pallas(hidden, P, *, nhead, h_true):
    """hidden: (B, S, H) f32.  Runs all stacked encoder layers in one pallas_call."""
    B, S, H = hidden.shape
    L = P["wq"].shape[0]
    Hp = P["wo"].shape[-1]
    Fp = P["w1"].shape[-1]
    hdp = Hp // nhead

    # Zero-pad activation to the lane-dense width, fold batch into rows.
    x2d = jnp.pad(hidden.reshape(B * S, H), ((0, 0), (0, Hp - H)))

    kernel = functools.partial(_encoder_layer_kernel,
                               nhead=nhead, h_true=h_true, eps=1e-5)

    def wspec(*dims):                          # layer-stacked weight: squeeze leading L dim
        nd = len(dims)
        return pl.BlockSpec((None,) + dims, lambda b, l, _nd=nd: (l,) + (0,) * _nd)

    in_specs = [
        pl.BlockSpec((S, Hp), lambda b, l: (b, 0)),          # x rows for batch b
        wspec(nhead, Hp, hdp), wspec(nhead, 1, hdp),         # Wq, bq (scale folded)
        wspec(nhead, Hp, hdp), wspec(nhead, 1, hdp),         # Wk, bk
        wspec(nhead, Hp, hdp), wspec(nhead, 1, hdp),         # Wv, bv
        wspec(nhead, hdp, Hp), wspec(1, Hp),                 # Wo (per-head rows), bo
        wspec(1, Hp), wspec(1, Hp),                          # LN1 gamma/beta
        wspec(Hp, Fp), wspec(1, Fp),                         # linear1
        wspec(Fp, Hp), wspec(1, Hp),                         # linear2
        wspec(1, Hp), wspec(1, Hp),                          # LN2 gamma/beta
    ]

    flops = L * B * (3 * 2 * S * Hp * Hp      # q/k/v projections
                     + 4 * S * S * Hp         # scores + context (all heads)
                     + 2 * S * Hp * Hp        # out projection
                     + 4 * S * Hp * Fp)       # feed-forward
    transcendentals = L * B * (nhead * S * S + nhead * S + 2 * S)
    bytes_accessed = (int(x2d.size) * 4 + B * S * Hp * 4
                      + sum(int(v.size) * v.dtype.itemsize for v in P.values()))

    # NOTE: at this config everything fits comfortably in VMEM on v5e/v6e/v7x
    # defaults; re-derive vmem_limit_bytes / add row tiling before scaling H/F.
    out2d = pl.pallas_call(
        kernel,
        out_shape=jax.ShapeDtypeStruct((B * S, Hp), jnp.float32),
        grid_spec=pltpu.PrefetchScalarGridSpec(
            num_scalar_prefetch=0,
            grid=(B, L),                                     # batch parallel, layers sequential
            in_specs=in_specs,
            out_specs=pl.BlockSpec((S, Hp), lambda b, l: (b, 0)),
        ),
        compiler_params=pltpu.CompilerParams(
            dimension_semantics=("parallel", "arbitrary")),
        cost_estimate=pl.CostEstimate(flops=int(flops),
                                      transcendentals=int(transcendentals),
                                      bytes_accessed=int(bytes_accessed)),
    )(x2d, P["wq"], P["bq"], P["wk"], P["bk"], P["wv"], P["bv"],
      P["wo"], P["bo"], P["g1"], P["be1"], P["w1"], P["b1"],
      P["w2"], P["b2"], P["g2"], P["be2"])

    return out2d[:, :H].reshape(B, S, H)


# ---------------------------- parameter handling ---------------------------- #
def init_params(key, *, n_node, hidden, nhead, feedforward, n_layers):
    """Every parameter ~ U(-1/sqrt(H), 1/sqrt(H)), mirroring reset_parameters()."""
    stdv = 1.0 / math.sqrt(hidden)
    F = hidden * feedforward

    def u(k, shape):
        return jax.random.uniform(k, shape, jnp.float32, -stdv, stdv)

    keys = jax.random.split(key, 1 + n_layers)
    emb = u(keys[0], (n_node, hidden))
    layers = []
    for li in range(n_layers):
        ks = jax.random.split(keys[1 + li], 16)
        layers.append(dict(
            wq=u(ks[0], (hidden, hidden)), bq=u(ks[1], (1, hidden)),
            wk=u(ks[2], (hidden, hidden)), bk=u(ks[3], (1, hidden)),
            wv=u(ks[4], (hidden, hidden)), bv=u(ks[5], (1, hidden)),
            wo=u(ks[6], (hidden, hidden)), bo=u(ks[7], (1, hidden)),
            g1=u(ks[8], (1, hidden)), be1=u(ks[9], (1, hidden)),
            w1=u(ks[10], (hidden, F)), b1=u(ks[11], (1, F)),
            w2=u(ks[12], (F, hidden)), b2=u(ks[13], (1, hidden)),
            g2=u(ks[14], (1, hidden)), be2=u(ks[15], (1, hidden)),
        ))
    return emb, layers


def stack_and_pad_params(layers, *, nhead):
    """One-time prep: stack per-layer params on a leading layer axis, split
    Q/K/V/O per head, fold the 1/sqrt(head_dim) softmax scale into Wq/bq,
    zero-pad all lane dims up to multiples of 128 (per-head dims to Hp/nhead)
    and store the big matrices as bf16 (MXU operands, half the DMA bytes)."""
    H = layers[0]["wq"].shape[0]
    F = layers[0]["w1"].shape[1]
    hd = H // nhead
    Hp = _round_up(H, 128)
    assert Hp % nhead == 0, "nhead must divide the padded hidden size"
    hdp = Hp // nhead
    Fp = _round_up(F, 128)
    scale = 1.0 / math.sqrt(hd)

    def pad2(a, r, c):
        return jnp.pad(a, ((0, r - a.shape[0]), (0, c - a.shape[1])))

    def split_cols(w, s=1.0):                 # (H, H) -> (nhead, Hp, hdp)
        return jnp.stack([pad2(w[:, h * hd:(h + 1) * hd] * s, Hp, hdp)
                          for h in range(nhead)])

    def split_bias(b, s=1.0):                 # (1, H) -> (nhead, 1, hdp)
        return jnp.stack([pad2(b[:, h * hd:(h + 1) * hd] * s, 1, hdp)
                          for h in range(nhead)])

    def split_rows(w):                        # (H, H) -> (nhead, hdp, Hp)
        return jnp.stack([pad2(w[h * hd:(h + 1) * hd, :], hdp, Hp)
                          for h in range(nhead)])

    def stk(fn, name, *args):
        return jnp.stack([fn(p[name], *args) for p in layers])

    return dict(
        wq=stk(split_cols, "wq", scale).astype(jnp.bfloat16),
        bq=stk(split_bias, "bq", scale),
        wk=stk(split_cols, "wk").astype(jnp.bfloat16), bk=stk(split_bias, "bk"),
        wv=stk(split_cols, "wv").astype(jnp.bfloat16), bv=stk(split_bias, "bv"),
        wo=stk(split_rows, "wo").astype(jnp.bfloat16),
        bo=jnp.stack([pad2(p["bo"], 1, Hp) for p in layers]),
        g1=jnp.stack([pad2(p["g1"], 1, Hp) for p in layers]),
        be1=jnp.stack([pad2(p["be1"], 1, Hp) for p in layers]),
        w1=jnp.stack([pad2(p["w1"], Hp, Fp) for p in layers]).astype(jnp.bfloat16),
        b1=jnp.stack([pad2(p["b1"], 1, Fp) for p in layers]),
        w2=jnp.stack([pad2(p["w2"], Fp, Hp) for p in layers]).astype(jnp.bfloat16),
        b2=jnp.stack([pad2(p["b2"], 1, Hp) for p in layers]),
        g2=jnp.stack([pad2(p["g2"], 1, Hp) for p in layers]),
        be2=jnp.stack([pad2(p["be2"], 1, Hp) for p in layers]),
    )


# ------------------------------- forward pass ------------------------------- #
def self_attention_network_forward(inputs, A, emb, stacked_layers, *, nhead):
    """Equivalent of SelfAttentionNetwork.forward(inputs, A). A is unused."""
    del A
    H = emb.shape[1]
    hidden = emb[inputs].astype(jnp.float32)       # embedding gather (plain JAX glue)
    return encoder_forward_pallas(hidden, stacked_layers, nhead=nhead, h_true=H)


# ---------------------------- pure-JAX reference ---------------------------- #
def _ref_layer(x, p, nhead):
    """Reference post-norm encoder layer; mirrors the kernel's bf16-on-MXU /
    f32-elsewhere precision so the comparison tolerance can stay tight."""
    B, S, H = x.shape
    hd = H // nhead
    scale = 1.0 / math.sqrt(hd)
    eps = 1e-5

    def mm(a, w):
        return jnp.dot(a.astype(jnp.bfloat16), w.astype(jnp.bfloat16),
                       preferred_element_type=jnp.float32)

    x2 = x.reshape(B * S, H)
    outs = []
    for h in range(nhead):
        sl = slice(h * hd, (h + 1) * hd)
        q = (mm(x2, p["wq"][:, sl] * scale) + p["bq"][:, sl] * scale).reshape(B, S, hd)
        k = (mm(x2, p["wk"][:, sl]) + p["bk"][:, sl]).reshape(B, S, hd)
        v = (mm(x2, p["wv"][:, sl]) + p["bv"][:, sl]).reshape(B, S, hd)
        s = jnp.einsum('bqd,bkd->bqk', q.astype(jnp.bfloat16), k.astype(jnp.bfloat16),
                       preferred_element_type=jnp.float32)
        pa = jax.nn.softmax(s, axis=-1)
        outs.append(jnp.einsum('bqk,bkd->bqd', pa.astype(jnp.bfloat16),
                               v.astype(jnp.bfloat16),
                               preferred_element_type=jnp.float32))
    attn = jnp.concatenate(outs, axis=-1).reshape(B * S, H)
    attn = mm(attn, p["wo"]) + p["bo"]
    y = x2 + attn
    mu = y.mean(-1, keepdims=True)
    var = ((y - mu) ** 2).mean(-1, keepdims=True)
    y = (y - mu) * lax.rsqrt(var + eps) * p["g1"] + p["be1"]
    h1 = jnp.maximum(mm(y, p["w1"]) + p["b1"], 0.0)
    h2 = mm(h1, p["w2"]) + p["b2"]
    z = y + h2
    mu2 = z.mean(-1, keepdims=True)
    var2 = ((z - mu2) ** 2).mean(-1, keepdims=True)
    z = (z - mu2) * lax.rsqrt(var2 + eps) * p["g2"] + p["be2"]
    return z.reshape(B, S, H)


# ----------------------------------- main ----------------------------------- #
if __name__ == "__main__":
    # Module-consistent small config: opt.hiddenSize=32, opt.nhead=2,
    # opt.feedforward=4, opt.layer=2, n_node=50, batch=2, seq=8.
    B, S, H = 2, 8, 32
    NHEAD, FEEDFORWARD, NLAYERS, N_NODE = 2, 4, 2, 50

    key = jax.random.PRNGKey(0)
    kp, ki = jax.random.split(key)
    emb, layers = init_params(kp, n_node=N_NODE, hidden=H, nhead=NHEAD,
                              feedforward=FEEDFORWARD, n_layers=NLAYERS)
    stacked = stack_and_pad_params(layers, nhead=NHEAD)

    inputs = jax.random.randint(ki, (B, S), 0, N_NODE, dtype=jnp.int32)
    A = jnp.zeros((B, S, S), dtype=jnp.float32)      # unused by forward()

    out = self_attention_network_forward(inputs, A, emb, stacked, nhead=NHEAD)
    out = jax.block_until_ready(out)

    # Correctness check against a pure-JAX reference with matching precision.
    ref = emb[inputs].astype(jnp.float32)
    for p in layers:
        ref = _ref_layer(ref, p, NHEAD)
    np.testing.assert_allclose(np.asarray(out), np.asarray(ref),
                               atol=2e-3, rtol=2e-3)
    print("KERNEL_OK")
</pallas_src>

<mosaic_0001>
module attributes {stable_mosaic.version = 11 : i64} {
  func.func @_encoder_layer_kernel(%arg0: i32, %arg1: i32, %arg2: memref<8x128xf32, #tpu.memory_space<vmem>>, %arg3: memref<1x2x128x64xbf16, #tpu.memory_space<vmem>>, %arg4: memref<1x2x1x64xf32, #tpu.memory_space<vmem>>, %arg5: memref<1x2x128x64xbf16, #tpu.memory_space<vmem>>, %arg6: memref<1x2x1x64xf32, #tpu.memory_space<vmem>>, %arg7: memref<1x2x128x64xbf16, #tpu.memory_space<vmem>>, %arg8: memref<1x2x1x64xf32, #tpu.memory_space<vmem>>, %arg9: memref<1x2x64x128xbf16, #tpu.memory_space<vmem>>, %arg10: memref<1x1x128xf32, #tpu.memory_space<vmem>>, %arg11: memref<1x1x128xf32, #tpu.memory_space<vmem>>, %arg12: memref<1x1x128xf32, #tpu.memory_space<vmem>>, %arg13: memref<1x128x128xbf16, #tpu.memory_space<vmem>>, %arg14: memref<1x1x128xf32, #tpu.memory_space<vmem>>, %arg15: memref<1x128x128xbf16, #tpu.memory_space<vmem>>, %arg16: memref<1x1x128xf32, #tpu.memory_space<vmem>>, %arg17: memref<1x1x128xf32, #tpu.memory_space<vmem>>, %arg18: memref<1x1x128xf32, #tpu.memory_space<vmem>>, %arg19: memref<8x128xf32, #tpu.memory_space<vmem>>) attributes {dimension_semantics = [#tpu.dimension_semantics<parallel>, #tpu.dimension_semantics<arbitrary>], iteration_bounds = array<i64: 2, 2>, scalar_prefetch = 0 : i64, scratch_operands = 0 : i64, tpu.core_type = #tpu.core_type<tc>, window_params = [{transform_indices = @transform_0, window_bounds = array<i64: 8, 128>}, {transform_indices = @transform_1, window_bounds = array<i64: 1, 2, 128, 64>}, {transform_indices = @transform_2, window_bounds = array<i64: 1, 2, 1, 64>}, {transform_indices = @transform_3, window_bounds = array<i64: 1, 2, 128, 64>}, {transform_indices = @transform_4, window_bounds = array<i64: 1, 2, 1, 64>}, {transform_indices = @transform_5, window_bounds = array<i64: 1, 2, 128, 64>}, {transform_indices = @transform_6, window_bounds = array<i64: 1, 2, 1, 64>}, {transform_indices = @transform_7, window_bounds = array<i64: 1, 2, 64, 128>}, {transform_indices = @transform_8, window_bounds = array<i64: 1, 1, 128>}, {transform_indices = @transform_9, window_bounds = array<i64: 1, 1, 128>}, {transform_indices = @transform_10, window_bounds = array<i64: 1, 1, 128>}, {transform_indices = @transform_11, window_bounds = array<i64: 1, 128, 128>}, {transform_indices = @transform_12, window_bounds = array<i64: 1, 1, 128>}, {transform_indices = @transform_13, window_bounds = array<i64: 1, 128, 128>}, {transform_indices = @transform_14, window_bounds = array<i64: 1, 1, 128>}, {transform_indices = @transform_15, window_bounds = array<i64: 1, 1, 128>}, {transform_indices = @transform_16, window_bounds = array<i64: 1, 1, 128>}, {transform_indices = @transform_17, window_bounds = array<i64: 8, 128>}]} {
    %c0_i32 = arith.constant 0 : i32
    %0 = arith.cmpi eq, %arg1, %c0_i32 : i32
    %1 = arith.extui %0 : i1 to i32
    %c0_i32_0 = arith.constant 0 : i32
    %2 = arith.cmpi ne, %1, %c0_i32_0 : i32
    scf.if %2 {
      %c0_115 = arith.constant 0 : index
      %c0_116 = arith.constant 0 : index
      %167 = vector.load %arg2[%c0_115, %c0_116] : memref<8x128xf32, #tpu.memory_space<vmem>>, vector<8x128xf32>
      %c0_117 = arith.constant 0 : index
      %c0_118 = arith.constant 0 : index
      %168 = vector.load %arg19[%c0_117, %c0_118] : memref<8x128xf32, #tpu.memory_space<vmem>>, vector<8x128xf32>
      tpu.vector_store %arg19[%c0_117, %c0_118], %167 {strides = array<i32>} : memref<8x128xf32, #tpu.memory_space<vmem>>, vector<8x128xf32>,
    } else {
    }
    %c0 = arith.constant 0 : index
    %c0_1 = arith.constant 0 : index
    %3 = vector.load %arg19[%c0, %c0_1] : memref<8x128xf32, #tpu.memory_space<vmem>>, vector<8x128xf32>
    %4 = arith.truncf %3 : vector<8x128xf32> to vector<8x128xbf16>
    %cst = arith.constant 0.000000e+00 : f32
    %5 = vector.broadcast %cst : f32 to vector<8x128xf32>
    %c0_2 = arith.constant 0 : index
    %c0_3 = arith.constant 0 : index
    %c0_4 = arith.constant 0 : index
    %c0_5 = arith.constant 0 : index
    %6 = vector.load %arg3[%c0_2, %c0_3, %c0_4, %c0_5] : memref<1x2x128x64xbf16, #tpu.memory_space<vmem>>, vector<1x1x128x64xbf16>
    %7 = vector.shape_cast %6 : vector<1x1x128x64xbf16> to vector<128x64xbf16>
    %cst_6 = arith.constant dense<0.000000e+00> : vector<8x64xf32>
    %8 = tpu.matmul %4, %7, %cst_6 {dimension_numbers = #tpu.dot_dimension_numbers<[1], [0], [0], [1], [0, 0, 1, 1], [], []>} : vector<8x128xbf16>, vector<128x64xbf16>, vector<8x64xf32> -> vector<8x64xf32>
    %c0_7 = arith.constant 0 : index
    %c0_8 = arith.constant 0 : index
    %c0_9 = arith.constant 0 : index
    %c0_10 = arith.constant 0 : index
    %9 = vector.load %arg4[%c0_7, %c0_8, %c0_9, %c0_10] : memref<1x2x1x64xf32, #tpu.memory_space<vmem>>, vector<1x1x1x64xf32>
    %10 = vector.shape_cast %9 : vector<1x1x1x64xf32> to vector<1x64xf32>
    %11 = vector.broadcast %10 : vector<1x64xf32> to vector<8x64xf32>
    %12 = arith.addf %8, %11 : vector<8x64xf32>
    %c0_11 = arith.constant 0 : index
    %c0_12 = arith.constant 0 : index
    %c0_13 = arith.constant 0 : index
    %c0_14 = arith.constant 0 : index
    %13 = vector.load %arg5[%c0_11, %c0_12, %c0_13, %c0_14] : memref<1x2x128x64xbf16, #tpu.memory_space<vmem>>, vector<1x1x128x64xbf16>
    %14 = vector.shape_cast %13 : vector<1x1x128x64xbf16> to vector<128x64xbf16>
    %cst_15 = arith.constant dense<0.000000e+00> : vector<8x64xf32>
    %15 = tpu.matmul %4, %14, %cst_15 {dimension_numbers = #tpu.dot_dimension_numbers<[1], [0], [0], [1], [0, 0, 1, 1], [], []>} : vector<8x128xbf16>, vector<128x64xbf16>, vector<8x64xf32> -> vector<8x64xf32>
    %c0_16 = arith.constant 0 : index
    %c0_17 = arith.constant 0 : index
    %c0_18 = arith.constant 0 : index
    %c0_19 = arith.constant 0 : index
    %16 = vector.load %arg6[%c0_16, %c0_17, %c0_18, %c0_19] : memref<1x2x1x64xf32, #tpu.memory_space<vmem>>, vector<1x1x1x64xf32>
    %17 = vector.shape_cast %16 : vector<1x1x1x64xf32> to vector<1x64xf32>
    %18 = vector.broadcast %17 : vector<1x64xf32> to vector<8x64xf32>
    %19 = arith.addf %15, %18 : vector<8x64xf32>
    %c0_20 = arith.constant 0 : index
    %c0_21 = arith.constant 0 : index
    %c0_22 = arith.constant 0 : index
    %c0_23 = arith.constant 0 : index
    %20 = vector.load %arg7[%c0_20, %c0_21, %c0_22, %c0_23] : memref<1x2x128x64xbf16, #tpu.memory_space<vmem>>, vector<1x1x128x64xbf16>
    %21 = vector.shape_cast %20 : vector<1x1x128x64xbf16> to vector<128x64xbf16>
    %cst_24 = arith.constant dense<0.000000e+00> : vector<8x64xf32>
    %22 = tpu.matmul %4, %21, %cst_24 {dimension_numbers = #tpu.dot_dimension_numbers<[1], [0], [0], [1], [0, 0, 1, 1], [], []>} : vector<8x128xbf16>, vector<128x64xbf16>, vector<8x64xf32> -> vector<8x64xf32>
    %c0_25 = arith.constant 0 : index
    %c0_26 = arith.constant 0 : index
    %c0_27 = arith.constant 0 : index
    %c0_28 = arith.constant 0 : index
    %23 = vector.load %arg8[%c0_25, %c0_26, %c0_27, %c0_28] : memref<1x2x1x64xf32, #tpu.memory_space<vmem>>, vector<1x1x1x64xf32>
    %24 = vector.shape_cast %23 : vector<1x1x1x64xf32> to vector<1x64xf32>
    %25 = vector.broadcast %24 : vector<1x64xf32> to vector<8x64xf32>
    %26 = arith.addf %22, %25 : vector<8x64xf32>
    %27 = arith.truncf %12 : vector<8x64xf32> to vector<8x64xbf16>
    %28 = arith.truncf %19 : vector<8x64xf32> to vector<8x64xbf16>
    %cst_29 = arith.constant dense<0.000000e+00> : vector<8x8xf32>
    %29 = tpu.matmul %27, %28, %cst_29 {dimension_numbers = #tpu.dot_dimension_numbers<[1], [1], [0], [0], [0, 0, 1, 0], [], []>} : vector<8x64xbf16>, vector<8x64xbf16>, vector<8x8xf32> -> vector<8x8xf32>
    %cst_30 = arith.constant dense<0xFF800000> : vector<8xf32>
    %30 = vector.multi_reduction <maximumf>, %29, %cst_30 [1] : vector<8x8xf32> to vector<8xf32>
    %31 = vector.shape_cast %30 : vector<8xf32> to vector<8x1xf32>
    %32 = vector.broadcast %31 : vector<8x1xf32> to vector<8x8xf32>
    %33 = arith.subf %29, %32 : vector<8x8xf32>
    %34 = math.exp %33 : vector<8x8xf32>
    %cst_31 = arith.constant dense<0.000000e+00> : vector<8xf32>
    %35 = vector.multi_reduction <add>, %34, %cst_31 [1] : vector<8x8xf32> to vector<8xf32>
    %36 = vector.shape_cast %35 : vector<8xf32> to vector<8x1xf32>
    %37 = tpu.reciprocal %36 {approx = true} : vector<8x1xf32> -> vector<8x1xf32>
    %38 = vector.broadcast %37 : vector<8x1xf32> to vector<8x8xf32>
    %39 = arith.mulf %34, %38 : vector<8x8xf32>
    %40 = arith.truncf %39 : vector<8x8xf32> to vector<8x8xbf16>
    %41 = arith.truncf %26 : vector<8x64xf32> to vector<8x64xbf16>
    %cst_32 = arith.constant dense<0.000000e+00> : vector<8x64xf32>
    %42 = tpu.matmul %40, %41, %cst_32 {dimension_numbers = #tpu.dot_dimension_numbers<[1], [0], [0], [1], [0, 0, 1, 1], [], []>} : vector<8x8xbf16>, vector<8x64xbf16>, vector<8x64xf32> -> vector<8x64xf32>
    %43 = arith.truncf %42 : vector<8x64xf32> to vector<8x64xbf16>
    %c0_33 = arith.constant 0 : index
    %c0_34 = arith.constant 0 : index
    %c0_35 = arith.constant 0 : index
    %c0_36 = arith.constant 0 : index
    %44 = vector.load %arg9[%c0_33, %c0_34, %c0_35, %c0_36] : memref<1x2x64x128xbf16, #tpu.memory_space<vmem>>, vector<1x1x64x128xbf16>
    %45 = vector.shape_cast %44 : vector<1x1x64x128xbf16> to vector<64x128xbf16>
    %cst_37 = arith.constant dense<0.000000e+00> : vector<8x128xf32>
    %46 = tpu.matmul %43, %45, %cst_37 {dimension_numbers = #tpu.dot_dimension_numbers<[1], [0], [0], [1], [0, 0, 1, 1], [], []>} : vector<8x64xbf16>, vector<64x128xbf16>, vector<8x128xf32> -> vector<8x128xf32>
    %47 = arith.addf %5, %46 : vector<8x128xf32>
    %c0_38 = arith.constant 0 : index
    %c1 = arith.constant 1 : index
    %c0_39 = arith.constant 0 : index
    %c0_40 = arith.constant 0 : index
    %48 = vector.load %arg3[%c0_38, %c1, %c0_39, %c0_40] : memref<1x2x128x64xbf16, #tpu.memory_space<vmem>>, vector<1x1x128x64xbf16>
    %49 = vector.shape_cast %48 : vector<1x1x128x64xbf16> to vector<128x64xbf16>
    %cst_41 = arith.constant dense<0.000000e+00> : vector<8x64xf32>
    %50 = tpu.matmul %4, %49, %cst_41 {dimension_numbers = #tpu.dot_dimension_numbers<[1], [0], [0], [1], [0, 0, 1, 1], [], []>} : vector<8x128xbf16>, vector<128x64xbf16>, vector<8x64xf32> -> vector<8x64xf32>
    %c0_42 = arith.constant 0 : index
    %c1_43 = arith.constant 1 : index
    %c0_44 = arith.constant 0 : index
    %c0_45 = arith.constant 0 : index
    %51 = vector.load %arg4[%c0_42, %c1_43, %c0_44, %c0_45] : memref<1x2x1x64xf32, #tpu.memory_space<vmem>>, vector<1x1x1x64xf32>
    %52 = vector.shape_cast %51 : vector<1x1x1x64xf32> to vector<1x64xf32>
    %53 = vector.broadcast %52 : vector<1x64xf32> to vector<8x64xf32>
    %54 = arith.addf %50, %53 : vector<8x64xf32>
    %c0_46 = arith.constant 0 : index
    %c1_47 = arith.constant 1 : index
    %c0_48 = arith.constant 0 : index
    %c0_49 = arith.constant 0 : index
    %55 = vector.load %arg5[%c0_46, %c1_47, %c0_48, %c0_49] : memref<1x2x128x64xbf16, #tpu.memory_space<vmem>>, vector<1x1x128x64xbf16>
    %56 = vector.shape_cast %55 : vector<1x1x128x64xbf16> to vector<128x64xbf16>
    %cst_50 = arith.constant dense<0.000000e+00> : vector<8x64xf32>
    %57 = tpu.matmul %4, %56, %cst_50 {dimension_numbers = #tpu.dot_dimension_numbers<[1], [0], [0], [1], [0, 0, 1, 1], [], []>} : vector<8x128xbf16>, vector<128x64xbf16>, vector<8x64xf32> -> vector<8x64xf32>
    %c0_51 = arith.constant 0 : index
    %c1_52 = arith.constant 1 : index
    %c0_53 = arith.constant 0 : index
    %c0_54 = arith.constant 0 : index
    %58 = vector.load %arg6[%c0_51, %c1_52, %c0_53, %c0_54] : memref<1x2x1x64xf32, #tpu.memory_space<vmem>>, vector<1x1x1x64xf32>
    %59 = vector.shape_cast %58 : vector<1x1x1x64xf32> to vector<1x64xf32>
    %60 = vector.broadcast %59 : vector<1x64xf32> to vector<8x64xf32>
    %61 = arith.addf %57, %60 : vector<8x64xf32>
    %c0_55 = arith.constant 0 : index
    %c1_56 = arith.constant 1 : index
    %c0_57 = arith.constant 0 : index
    %c0_58 = arith.constant 0 : index
    %62 = vector.load %arg7[%c0_55, %c1_56, %c0_57, %c0_58] : memref<1x2x128x64xbf16, #tpu.memory_space<vmem>>, vector<1x1x128x64xbf16>
    %63 = vector.shape_cast %62 : vector<1x1x128x64xbf16> to vector<128x64xbf16>
    %cst_59 = arith.constant dense<0.000000e+00> : vector<8x64xf32>
    %64 = tpu.matmul %4, %63, %cst_59 {dimension_numbers = #tpu.dot_dimension_numbers<[1], [0], [0], [1], [0, 0, 1, 1], [], []>} : vector<8x128xbf16>, vector<128x64xbf16>, vector<8x64xf32> -> vector<8x64xf32>
    %c0_60 = arith.constant 0 : index
    %c1_61 = arith.constant 1 : index
    %c0_62 = arith.constant 0 : index
    %c0_63 = arith.constant 0 : index
    %65 = vector.load %arg8[%c0_60, %c1_61, %c0_62, %c0_63] : memref<1x2x1x64xf32, #tpu.memory_space<vmem>>, vector<1x1x1x64xf32>
    %66 = vector.shape_cast %65 : vector<1x1x1x64xf32> to vector<1x64xf32>
    %67 = vector.broadcast %66 : vector<1x64xf32> to vector<8x64xf32>
    %68 = arith.addf %64, %67 : vector<8x64xf32>
    %69 = arith.truncf %54 : vector<8x64xf32> to vector<8x64xbf16>
    %70 = arith.truncf %61 : vector<8x64xf32> to vector<8x64xbf16>
    %cst_64 = arith.constant dense<0.000000e+00> : vector<8x8xf32>
    %71 = tpu.matmul %69, %70, %cst_64 {dimension_numbers = #tpu.dot_dimension_numbers<[1], [1], [0], [0], [0, 0, 1, 0], [], []>} : vector<8x64xbf16>, vector<8x64xbf16>, vector<8x8xf32> -> vector<8x8xf32>
    %cst_65 = arith.constant dense<0xFF800000> : vector<8xf32>
    %72 = vector.multi_reduction <maximumf>, %71, %cst_65 [1] : vector<8x8xf32> to vector<8xf32>
    %73 = vector.shape_cast %72 : vector<8xf32> to vector<8x1xf32>
    %74 = vector.broadcast %73 : vector<8x1xf32> to vector<8x8xf32>
    %75 = arith.subf %71, %74 : vector<8x8xf32>
    %76 = math.exp %75 : vector<8x8xf32>
    %cst_66 = arith.constant dense<0.000000e+00> : vector<8xf32>
    %77 = vector.multi_reduction <add>, %76, %cst_66 [1] : vector<8x8xf32> to vector<8xf32>
    %78 = vector.shape_cast %77 : vector<8xf32> to vector<8x1xf32>
    %79 = tpu.reciprocal %78 {approx = true} : vector<8x1xf32> -> vector<8x1xf32>
    %80 = vector.broadcast %79 : vector<8x1xf32> to vector<8x8xf32>
    %81 = arith.mulf %76, %80 : vector<8x8xf32>
    %82 = arith.truncf %81 : vector<8x8xf32> to vector<8x8xbf16>
    %83 = arith.truncf %68 : vector<8x64xf32> to vector<8x64xbf16>
    %cst_67 = arith.constant dense<0.000000e+00> : vector<8x64xf32>
    %84 = tpu.matmul %82, %83, %cst_67 {dimension_numbers = #tpu.dot_dimension_numbers<[1], [0], [0], [1], [0, 0, 1, 1], [], []>} : vector<8x8xbf16>, vector<8x64xbf16>, vector<8x64xf32> -> vector<8x64xf32>
    %85 = arith.truncf %84 : vector<8x64xf32> to vector<8x64xbf16>
    %c0_68 = arith.constant 0 : index
    %c1_69 = arith.constant 1 : index
    %c0_70 = arith.constant 0 : index
    %c0_71 = arith.constant 0 : index
    %86 = vector.load %arg9[%c0_68, %c1_69, %c0_70, %c0_71] : memref<1x2x64x128xbf16, #tpu.memory_space<vmem>>, vector<1x1x64x128xbf16>
    %87 = vector.shape_cast %86 : vector<1x1x64x128xbf16> to vector<64x128xbf16>
    %cst_72 = arith.constant dense<0.000000e+00> : vector<8x128xf32>
    %88 = tpu.matmul %85, %87, %cst_72 {dimension_numbers = #tpu.dot_dimension_numbers<[1], [0], [0], [1], [0, 0, 1, 1], [], []>} : vector<8x64xbf16>, vector<64x128xbf16>, vector<8x128xf32> -> vector<8x128xf32>
    %89 = arith.addf %47, %88 : vector<8x128xf32>
    %c0_73 = arith.constant 0 : index
    %c0_74 = arith.constant 0 : index
    %c0_75 = arith.constant 0 : index
    %90 = vector.load %arg10[%c0_73, %c0_74, %c0_75] : memref<1x1x128xf32, #tpu.memory_space<vmem>>, vector<1x1x128xf32>
    %91 = vector.shape_cast %90 : vector<1x1x128xf32> to vector<1x128xf32>
    %92 = vector.broadcast %91 : vector<1x128xf32> to vector<8x128xf32>
    %93 = arith.addf %89, %92 : vector<8x128xf32>
    %94 = arith.addf %3, %93 : vector<8x128xf32>
    %cst_76 = arith.constant dense<0.000000e+00> : vector<8xf32>
    %95 = vector.multi_reduction <add>, %94, %cst_76 [1] : vector<8x128xf32> to vector<8xf32>
    %96 = vector.shape_cast %95 : vector<8xf32> to vector<8x1xf32>
    %cst_77 = arith.constant 3.125000e-02 : f32
    %97 = vector.broadcast %cst_77 : f32 to vector<8x1xf32>
    %98 = arith.mulf %96, %97 : vector<8x1xf32>
    %99 = arith.mulf %94, %94 : vector<8x128xf32>
    %cst_78 = arith.constant dense<0.000000e+00> : vector<8xf32>
    %100 = vector.multi_reduction <add>, %99, %cst_78 [1] : vector<8x128xf32> to vector<8xf32>
    %101 = vector.shape_cast %100 : vector<8xf32> to vector<8x1xf32>
    %cst_79 = arith.constant 3.125000e-02 : f32
    %102 = vector.broadcast %cst_79 : f32 to vector<8x1xf32>
    %103 = arith.mulf %101, %102 : vector<8x1xf32>
    %104 = arith.mulf %98, %98 : vector<8x1xf32>
    %105 = arith.subf %103, %104 : vector<8x1xf32>
    %106 = vector.broadcast %98 : vector<8x1xf32> to vector<8x128xf32>
    %107 = arith.subf %94, %106 : vector<8x128xf32>
    %cst_80 = arith.constant 9.99999974E-6 : f32
    %108 = vector.broadcast %cst_80 : f32 to vector<8x1xf32>
    %109 = arith.addf %105, %108 : vector<8x1xf32>
    %110 = math.rsqrt %109 : vector<8x1xf32>
    %111 = vector.broadcast %110 : vector<8x1xf32> to vector<8x128xf32>
    %112 = arith.mulf %107, %111 : vector<8x128xf32>
    %c0_81 = arith.constant 0 : index
    %c0_82 = arith.constant 0 : index
    %c0_83 = arith.constant 0 : index
    %113 = vector.load %arg11[%c0_81, %c0_82, %c0_83] : memref<1x1x128xf32, #tpu.memory_space<vmem>>, vector<1x1x128xf32>
    %114 = vector.shape_cast %113 : vector<1x1x128xf32> to vector<1x128xf32>
    %115 = vector.broadcast %114 : vector<1x128xf32> to vector<8x128xf32>
    %116 = arith.mulf %112, %115 : vector<8x128xf32>
    %c0_84 = arith.constant 0 : index
    %c0_85 = arith.constant 0 : index
    %c0_86 = arith.constant 0 : index
    %117 = vector.load %arg12[%c0_84, %c0_85, %c0_86] : memref<1x1x128xf32, #tpu.memory_space<vmem>>, vector<1x1x128xf32>
    %118 = vector.shape_cast %117 : vector<1x1x128xf32> to vector<1x128xf32>
    %119 = vector.broadcast %118 : vector<1x128xf32> to vector<8x128xf32>
    %120 = arith.addf %116, %119 : vector<8x128xf32>
    %121 = arith.truncf %120 : vector<8x128xf32> to vector<8x128xbf16>
    %c0_87 = arith.constant 0 : index
    %c0_88 = arith.constant 0 : index
    %c0_89 = arith.constant 0 : index
    %122 = vector.load %arg13[%c0_87, %c0_88, %c0_89] : memref<1x128x128xbf16, #tpu.memory_space<vmem>>, vector<1x128x128xbf16>
    %123 = vector.shape_cast %122 : vector<1x128x128xbf16> to vector<128x128xbf16>
    %cst_90 = arith.constant dense<0.000000e+00> : vector<8x128xf32>
    %124 = tpu.matmul %121, %123, %cst_90 {dimension_numbers = #tpu.dot_dimension_numbers<[1], [0], [0], [1], [0, 0, 1, 1], [], []>} : vector<8x128xbf16>, vector<128x128xbf16>, vector<8x128xf32> -> vector<8x128xf32>
    %c0_91 = arith.constant 0 : index
    %c0_92 = arith.constant 0 : index
    %c0_93 = arith.constant 0 : index
    %125 = vector.load %arg14[%c0_91, %c0_92, %c0_93] : memref<1x1x128xf32, #tpu.memory_space<vmem>>, vector<1x1x128xf32>
    %126 = vector.shape_cast %125 : vector<1x1x128xf32> to vector<1x128xf32>
    %127 = vector.broadcast %126 : vector<1x128xf32> to vector<8x128xf32>
    %128 = arith.addf %124, %127 : vector<8x128xf32>
    %cst_94 = arith.constant 0.000000e+00 : f32
    %129 = vector.broadcast %cst_94 : f32 to vector<8x128xf32>
    %130 = arith.maximumf %128, %129 : vector<8x128xf32>
    %131 = arith.truncf %130 : vector<8x128xf32> to vector<8x128xbf16>
    %c0_95 = arith.constant 0 : index
    %c0_96 = arith.constant 0 : index
    %c0_97 = arith.constant 0 : index
    %132 = vector.load %arg15[%c0_95, %c0_96, %c0_97] : memref<1x128x128xbf16, #tpu.memory_space<vmem>>, vector<1x128x128xbf16>
    %133 = vector.shape_cast %132 : vector<1x128x128xbf16> to vector<128x128xbf16>
    %cst_98 = arith.constant dense<0.000000e+00> : vector<8x128xf32>
    %134 = tpu.matmul %131, %133, %cst_98 {dimension_numbers = #tpu.dot_dimension_numbers<[1], [0], [0], [1], [0, 0, 1, 1], [], []>} : vector<8x128xbf16>, vector<128x128xbf16>, vector<8x128xf32> -> vector<8x128xf32>
    %c0_99 = arith.constant 0 : index
    %c0_100 = arith.constant 0 : index
    %c0_101 = arith.constant 0 : index
    %135 = vector.load %arg16[%c0_99, %c0_100, %c0_101] : memref<1x1x128xf32, #tpu.memory_space<vmem>>, vector<1x1x128xf32>
    %136 = vector.shape_cast %135 : vector<1x1x128xf32> to vector<1x128xf32>
    %137 = vector.broadcast %136 : vector<1x128xf32> to vector<8x128xf32>
    %138 = arith.addf %134, %137 : vector<8x128xf32>
    %139 = arith.addf %120, %138 : vector<8x128xf32>
    %cst_102 = arith.constant dense<0.000000e+00> : vector<8xf32>
    %140 = vector.multi_reduction <add>, %139, %cst_102 [1] : vector<8x128xf32> to vector<8xf32>
    %141 = vector.shape_cast %140 : vector<8xf32> to vector<8x1xf32>
    %cst_103 = arith.constant 3.125000e-02 : f32
    %142 = vector.broadcast %cst_103 : f32 to vector<8x1xf32>
    %143 = arith.mulf %141, %142 : vector<8x1xf32>
    %144 = arith.mulf %139, %139 : vector<8x128xf32>
    %cst_104 = arith.constant dense<0.000000e+00> : vector<8xf32>
    %145 = vector.multi_reduction <add>, %144, %cst_104 [1] : vector<8x128xf32> to vector<8xf32>
    %146 = vector.shape_cast %145 : vector<8xf32> to vector<8x1xf32>
    %cst_105 = arith.constant 3.125000e-02 : f32
    %147 = vector.broadcast %cst_105 : f32 to vector<8x1xf32>
    %148 = arith.mulf %146, %147 : vector<8x1xf32>
    %149 = arith.mulf %143, %143 : vector<8x1xf32>
    %150 = arith.subf %148, %149 : vector<8x1xf32>
    %151 = vector.broadcast %143 : vector<8x1xf32> to vector<8x128xf32>
    %152 = arith.subf %139, %151 : vector<8x128xf32>
    %cst_106 = arith.constant 9.99999974E-6 : f32
    %153 = vector.broadcast %cst_106 : f32 to vector<8x1xf32>
    %154 = arith.addf %150, %153 : vector<8x1xf32>
    %155 = math.rsqrt %154 : vector<8x1xf32>
    %156 = vector.broadcast %155 : vector<8x1xf32> to vector<8x128xf32>
    %157 = arith.mulf %152, %156 : vector<8x128xf32>
    %c0_107 = arith.constant 0 : index
    %c0_108 = arith.constant 0 : index
    %c0_109 = arith.constant 0 : index
    %158 = vector.load %arg17[%c0_107, %c0_108, %c0_109] : memref<1x1x128xf32, #tpu.memory_space<vmem>>, vector<1x1x128xf32>
    %159 = vector.shape_cast %158 : vector<1x1x128xf32> to vector<1x128xf32>
    %160 = vector.broadcast %159 : vector<1x128xf32> to vector<8x128xf32>
    %161 = arith.mulf %157, %160 : vector<8x128xf32>
    %c0_110 = arith.constant 0 : index
    %c0_111 = arith.constant 0 : index
    %c0_112 = arith.constant 0 : index
    %162 = vector.load %arg18[%c0_110, %c0_111, %c0_112] : memref<1x1x128xf32, #tpu.memory_space<vmem>>, vector<1x1x128xf32>
    %163 = vector.shape_cast %162 : vector<1x1x128xf32> to vector<1x128xf32>
    %164 = vector.broadcast %163 : vector<1x128xf32> to vector<8x128xf32>
    %165 = arith.addf %161, %164 : vector<8x128xf32>
    %c0_113 = arith.constant 0 : index
    %c0_114 = arith.constant 0 : index
    %166 = vector.load %arg19[%c0_113, %c0_114] : memref<8x128xf32, #tpu.memory_space<vmem>>, vector<8x128xf32>
    tpu.vector_store %arg19[%c0_113, %c0_114], %165 {strides = array<i32>} : memref<8x128xf32, #tpu.memory_space<vmem>>, vector<8x128xf32>,
    return
  }
  func.func @transform_0(%arg0: i32, %arg1: i32) -> (i32, i32) {
    %c0_i32 = arith.constant 0 : i32
    %c0_i32_0 = arith.constant 0 : i32
    return %arg0, %c0_i32 : i32, i32
  }
  func.func @transform_1(%arg0: i32, %arg1: i32) -> (i32, i32, i32, i32) {
    %c0_i32 = arith.constant 0 : i32
    %c0_i32_0 = arith.constant 0 : i32
    %c0_i32_1 = arith.constant 0 : i32
    %c0_i32_2 = arith.constant 0 : i32
    return %arg1, %c0_i32, %c0_i32_0, %c0_i32_1 : i32, i32, i32, i32
  }
  func.func @transform_2(%arg0: i32, %arg1: i32) -> (i32, i32, i32, i32) {
    %c0_i32 = arith.constant 0 : i32
    %c0_i32_0 = arith.constant 0 : i32
    %c0_i32_1 = arith.constant 0 : i32
    %c0_i32_2 = arith.constant 0 : i32
    return %arg1, %c0_i32, %c0_i32_0, %c0_i32_1 : i32, i32, i32, i32
  }
  func.func @transform_3(%arg0: i32, %arg1: i32) -> (i32, i32, i32, i32) {
    %c0_i32 = arith.constant 0 : i32
    %c0_i32_0 = arith.constant 0 : i32
    %c0_i32_1 = arith.constant 0 : i32
    %c0_i32_2 = arith.constant 0 : i32
    return %arg1, %c0_i32, %c0_i32_0, %c0_i32_1 : i32, i32, i32, i32
  }
  func.func @transform_4(%arg0: i32, %arg1: i32) -> (i32, i32, i32, i32) {
    %c0_i32 = arith.constant 0 : i32
    %c0_i32_0 = arith.constant 0 : i32
    %c0_i32_1 = arith.constant 0 : i32
    %c0_i32_2 = arith.constant 0 : i32
    return %arg1, %c0_i32, %c0_i32_0, %c0_i32_1 : i32, i32, i32, i32
  }
  func.func @transform_5(%arg0: i32, %arg1: i32) -> (i32, i32, i32, i32) {
    %c0_i32 = arith.constant 0 : i32
    %c0_i32_0 = arith.constant 0 : i32
    %c0_i32_1 = arith.constant 0 : i32
    %c0_i32_2 = arith.constant 0 : i32
    return %arg1, %c0_i32, %c0_i32_0, %c0_i32_1 : i32, i32, i32, i32
  }
  func.func @transform_6(%arg0: i32, %arg1: i32) -> (i32, i32, i32, i32) {
    %c0_i32 = arith.constant 0 : i32
    %c0_i32_0 = arith.constant 0 : i32
    %c0_i32_1 = arith.constant 0 : i32
    %c0_i32_2 = arith.constant 0 : i32
    return %arg1, %c0_i32, %c0_i32_0, %c0_i32_1 : i32, i32, i32, i32
  }
  func.func @transform_7(%arg0: i32, %arg1: i32) -> (i32, i32, i32, i32) {
    %c0_i32 = arith.constant 0 : i32
    %c0_i32_0 = arith.constant 0 : i32
    %c0_i32_1 = arith.constant 0 : i32
    %c0_i32_2 = arith.constant 0 : i32
    return %arg1, %c0_i32, %c0_i32_0, %c0_i32_1 : i32, i32, i32, i32
  }
  func.func @transform_8(%arg0: i32, %arg1: i32) -> (i32, i32, i32) {
    %c0_i32 = arith.constant 0 : i32
    %c0_i32_0 = arith.constant 0 : i32
    %c0_i32_1 = arith.constant 0 : i32
    return %arg1, %c0_i32, %c0_i32_0 : i32, i32, i32
  }
  func.func @transform_9(%arg0: i32, %arg1: i32) -> (i32, i32, i32) {
    %c0_i32 = arith.constant 0 : i32
    %c0_i32_0 = arith.constant 0 : i32
    %c0_i32_1 = arith.constant 0 : i32
    return %arg1, %c0_i32, %c0_i32_0 : i32, i32, i32
  }
  func.func @transform_10(%arg0: i32, %arg1: i32) -> (i32, i32, i32) {
    %c0_i32 = arith.constant 0 : i32
    %c0_i32_0 = arith.constant 0 : i32
    %c0_i32_1 = arith.constant 0 : i32
    return %arg1, %c0_i32, %c0_i32_0 : i32, i32, i32
  }
  func.func @transform_11(%arg0: i32, %arg1: i32) -> (i32, i32, i32) {
    %c0_i32 = arith.constant 0 : i32
    %c0_i32_0 = arith.constant 0 : i32
    %c0_i32_1 = arith.constant 0 : i32
    return %arg1, %c0_i32, %c0_i32_0 : i32, i32, i32
  }
  func.func @transform_12(%arg0: i32, %arg1: i32) -> (i32, i32, i32) {
    %c0_i32 = arith.constant 0 : i32
    %c0_i32_0 = arith.constant 0 : i32
    %c0_i32_1 = arith.constant 0 : i32
    return %arg1, %c0_i32, %c0_i32_0 : i32, i32, i32
  }
  func.func @transform_13(%arg0: i32, %arg1: i32) -> (i32, i32, i32) {
    %c0_i32 = arith.constant 0 : i32
    %c0_i32_0 = arith.constant 0 : i32
    %c0_i32_1 = arith.constant 0 : i32
    return %arg1, %c0_i32, %c0_i32_0 : i32, i32, i32
  }
  func.func @transform_14(%arg0: i32, %arg1: i32) -> (i32, i32, i32) {
    %c0_i32 = arith.constant 0 : i32
    %c0_i32_0 = arith.constant 0 : i32
    %c0_i32_1 = arith.constant 0 : i32
    return %arg1, %c0_i32, %c0_i32_0 : i32, i32, i32
  }
  func.func @transform_15(%arg0: i32, %arg1: i32) -> (i32, i32, i32) {
    %c0_i32 = arith.constant 0 : i32
    %c0_i32_0 = arith.constant 0 : i32
    %c0_i32_1 = arith.constant 0 : i32
    return %arg1, %c0_i32, %c0_i32_0 : i32, i32, i32
  }
  func.func @transform_16(%arg0: i32, %arg1: i32) -> (i32, i32, i32) {
    %c0_i32 = arith.constant 0 : i32
    %c0_i32_0 = arith.constant 0 : i32
    %c0_i32_1 = arith.constant 0 : i32
    return %arg1, %c0_i32, %c0_i32_0 : i32, i32, i32
  }
  func.func @transform_17(%arg0: i32, %arg1: i32) -> (i32, i32) {
    %c0_i32 = arith.constant 0 : i32
    %c0_i32_0 = arith.constant 0 : i32
    return %arg0, %c0_i32 : i32, i32
  }
}

</mosaic_0001>

<bundles_post_ra>
// kernel: tpu_custom_call.1
= control target key start
LH: loop header
LB: loop body
LE: loop exit
PB: predicated region body
PF: predicated region fallthrough
CT: control target
= control target key end

     0   :  { %s3719_s0 = inlined_call_operand.vmem [shape: f32[16,128], index: 0, kind: input, shape index: {}]   ;;  %s3720_s1 = inlined_call_operand.vmem [shape: bf16[2,2,128,64], index: 1, kind: input, shape index: {}]   ;;  %s3721_s2 = inlined_call_operand.vmem [shape: f32[2,2,1,64], index: 2, kind: input, shape index: {}]   ;;  %s3722_s3 = inlined_call_operand.vmem [shape: bf16[2,2,128,64], index: 3, kind: input, shape index: {}]   ;;  %s3723_s4 = inlined_call_operand.vmem [shape: f32[2,2,1,64], index: 4, kind: input, shape index: {}]   ;;  %s3724_s5 = inlined_call_operand.vmem [shape: bf16[2,2,128,64], index: 5, kind: input, shape index: {}]   ;;  %s3725_s6 = inlined_call_operand.vmem [shape: f32[2,2,1,64], index: 6, kind: input, shape index: {}]   ;;  %s3726_s7 = inlined_call_operand.vmem [shape: bf16[2,2,64,128], index: 7, kind: input, shape index: {}]   ;;  %s3727_s8 = inlined_call_operand.vmem [shape: f32[2,1,128], index: 8, kind: input, shape index: {}]   ;;  %s3728_s9 = inlined_call_operand.vmem [shape: f32[2,1,128], index: 9, kind: input, shape index: {}]   ;;  %s3729_s10 = inlined_call_operand.vmem [shape: f32[2,1,128], index: 10, kind: input, shape index: {}]   ;;  %s3730_s11 = inlined_call_operand.vmem [shape: bf16[2,128,128], index: 11, kind: input, shape index: {}]   ;;  %s3731_s12 = inlined_call_operand.vmem [shape: f32[2,1,128], index: 12, kind: input, shape index: {}]   ;;  %s3732_s13 = inlined_call_operand.vmem [shape: bf16[2,128,128], index: 13, kind: input, shape index: {}]   ;;  %s3733_s14 = inlined_call_operand.vmem [shape: f32[2,1,128], index: 14, kind: input, shape index: {}]   ;;  %s3734_s15 = inlined_call_operand.vmem [shape: f32[2,1,128], index: 15, kind: input, shape index: {}]   ;;  %s3735_s16 = inlined_call_operand.vmem [shape: f32[2,1,128], index: 16, kind: input, shape index: {}]   ;;  %s3736_s17 = inlined_call_operand.hbm [shape: f32[16,128], index: 17, kind: output, shape index: {}]  }
   0x1   :  { %3755 = sst [smem:[#allocation21_spill]] %s3719_s0 }
   0x2   :  { %3756 = sst [smem:[#allocation22_spill]] %s3720_s1 }
   0x3   :  { %3757 = sst [smem:[#allocation23_spill]] %s3721_s2 }
   0x4   :  { %3758 = sst [smem:[#allocation24_spill]] %s3722_s3 }
   0x5   :  { %3759 = sst [smem:[#allocation25_spill]] %s3723_s4 }
   0x6   :  { %3760 = sst [smem:[#allocation26_spill]] %s3724_s5 }
   0x7   :  { %3761 = sst [smem:[#allocation27_spill]] %s3725_s6 }
   0x8   :  { %3762 = sst [smem:[#allocation28_spill]] %s3726_s7 }
   0x9   :  { %3763 = sst [smem:[#allocation29_spill]] %s3728_s9 }
   0xa   :  { %3764 = sst [smem:[#allocation30_spill]] %s3729_s10 }
   0xb   :  { %3765 = sst [smem:[#allocation31_spill]] %s3730_s11 }
   0xc   :  { %3766 = sst [smem:[#allocation32_spill]] %s3734_s15 }
   0xd   :  { %3767 = sst [smem:[#allocation33_spill]] %s3735_s16 }
   0xe   :  { %3768 = sst [smem:[#allocation34_spill]] %s3736_s17 }
   0xf   :  { %22 = vsyncpa [#allocation3], 0 }
  0x10   :  { %24 = vsyncpa [#allocation3 + $0x1], 0  ;;  %s3252_s24 = smov 0   ;;  %s3254_s25 = smov 0  }
  0x11   :  { %s3256_s26 = smov 0   ;;  %s3258_s27 = smov 0  }
  0x12   :  { %s3260_s28 = smov 0   ;;  %s3262_s29 = smov 0  }
  0x13   :  { %s3264_s0 = smov 0   ;;  %s3266_s30 = smov 0  }
  0x14 LB: > { %3769 = sst [smem:[#allocation5_spill]] %s3129_s24  ;;  %s2425_s18 = sadd.s32 4294967295, %s3157_s30   ;;  %s3157_s30 = sphi %s3266_s30, %s30_s30   ;;  %s3153_s0 = sphi %s3264_s0, %s3826_s0   ;;  %s3149_s29 = sphi %s3262_s29, %s3825_s29   ;;  %s3145_s28 = sphi %s3260_s28, %s3824_s28   ;;  %s3141_s27 = sphi %s3258_s27, %s3823_s27   ;;  %s3137_s26 = sphi %s3256_s26, %s3822_s26   ;;  %s3133_s25 = sphi %s3254_s25, %s3821_s25   ;;  %s3129_s24 = sphi %s3252_s24, %s3820_s24  }
  0x15   : > { %3770 = sst [smem:[#allocation6_spill]] %s3133_s25  ;;  %s2426_s19 = sadd.s32 4294967294, %s3157_s30  }
  0x16   : > { %3771 = sst [smem:[#allocation7_spill]] %s3137_s26  ;;  %s39_s1 = sadd.s32 1, %s3149_s29 }
  0x17   : > { %3772 = sst [smem:[#allocation8_spill]] %s3141_s27  ;;  %p40_p0 = scmp.ge.s32.totalorder %s39_s1, 2 }
  0x18   : > { %3773 = sst [smem:[#allocation9_spill]] %s3145_s28  ;;  %s42_s20 = sadd.s32 1, %s3153_s0 }
  0x19   : > { %3774 = sst [smem:[#allocation10_spill]] %s3149_s29  ;;  %p501_p1 = scmp.ne.s32.totalorder %s3137_s26, %s3133_s25 }
  0x1a   : > { %3775 = sst [smem:[#allocation11_spill]] %s3153_s0  ;;  %p502_p2 = scmp.eq.s32.totalorder %s2425_s18, 3 }
  0x1b   : > { %3776 = sst [smem:[#allocation12_spill]] %s3157_s30  ;;  %s3828_s1 = smov (%p40_p0, %s39_s1), 0 }
  0x1c   : > { %3777 = sst [smem:[#allocation13_spill]] %s3828_s1  ;;  %s3830_s20 = smov (!%p40_p0, %s42_s20), %s3153_s0 }
  0x1d   : > { %p3301_p3 = por %p502_p2, %p501_p1  ;;  %p507_p4 = scmp.ne.s32.totalorder %s3133_s25, %s3129_s24 }
  0x1e   : > { %p44_p5 = scmp.ge.s32.totalorder %s3830_s20, 2  ;;  %p508_p6 = scmp.eq.s32.totalorder %s2426_s19, 3 }
  0x1f   : > { %s3778_s21 = scalar_select %p3301_p3, 1, 0 }
  0x20   : > { %p2429_p7 = scmp.ge.s32.totalorder %s3157_s30, 1  ;;  %p644_p8 = scmp.lt.s32.totalorder %s3157_s30, 5 }
  0x21   : > { %3779 = sst [smem:[#allocation14_spill]] %s3778_s21  ;;  %s3832_s20 = smov (%p44_p5, %s3830_s20), 0 }
  0x22   : > { %3780 = sst [smem:[#allocation15_spill]] %s3832_s20  ;;  %p3311_p9 = por %p508_p6, %p507_p4 }
  0x23   : > { %p645_p10 = pnand %p2429_p7, %p644_p8  ;;  %s488_s23 = ssub.s32 %s3153_s0, %s3832_s20 }
  0x24   : > { %s3781_s22 = scalar_select %p3311_p9, 1, 0 }
  0x25   : > { %s491_s18 = sadd.s32 1, %s3137_s26  ;;  %p489_p11 = scmp.eq.s32.totalorder %s488_s23, 0 }
  0x26   : > { %3782 = sst [smem:[#allocation16_spill]] %s3781_s22  ;;  %648 = sbr.rel (%p645_p10) target bundleno = 2857 (0xb29), region = 88 }
  0x27   : > { %s3319_s1 = scalar_select %p489_p11, %s3137_s26, %s491_s18  }
  0x29   : > { %3783 = sst [smem:[#allocation17_spill]] %s3319_s1 }
  0x2d   : > { %s3746_s19 = sand.u32 1, %s3133_s25   ;;  %p758_p12 = scmp.lt.s32.totalorder %s3145_s28, 1 }
  0x2e   : > { %s2430_s29 = sshll.u32 %s3746_s19, 3  ;;  %p762_p13 = scmp.lt.s32.totalorder %s3141_s27, 1 }
  0x2f   : > { %s759_s24 = scalar_select %p758_p12, %s3145_s28, 1 }
  0x30   : > { %s3328_s22 = scalar_select %p762_p13, %s3141_s27, 1 }
  0x31   : > { %s2431_s23 = sshll.u32 %s759_s24, 3  ;;  %s3784_s0 = sld [smem:[#allocation21_spill]] }
  0x32   : > { %s2602_s26 = sshll.u32 %s3328_s22, 7  ;;  %s3785_s19 = sld [smem:[#allocation22_spill]] }
  0x33   : > { %s2434_s25 = sshll.u32 %s3328_s22, 1  ;;  %s3787_s2 = sld [smem:[#allocation23_spill]] }
  0x34   : > { %s3789_s3 = sld [smem:[#allocation24_spill]]  ;;  %s3790_s4 = sld [smem:[#allocation25_spill]] }
  0x35   : > { %s3792_s5 = sld [smem:[#allocation26_spill]]  ;;  %s3793_s6 = sld [smem:[#allocation27_spill]] }
  0x36   : > { %s3794_s7 = sld [smem:[#allocation28_spill]]  ;;  %s3797_s11 = sld [smem:[#allocation31_spill]] }
  0x37   : > { %s761_s1 = scalar_lea.vmem %s3784_s0, %s2431_s23  ;;  %s3409_s9 = scalar_lea.vmem [#allocation2], %s2430_s29 }
  0x38   : > { %s3337_s21 = scalar_lea.vmem %s3785_s19, %s2602_s26 }
  0x39   : > { %3786 = sst [smem:[#allocation18_spill]] %s3337_s21  ;;  %s3343_s16 = scalar_lea.vmem %s3787_s2, %s2434_s25 }
  0x3a   : > { %3788 = sst [smem:[#allocation19_spill]] %s3343_s16  ;;  %s3348_s20 = scalar_lea.vmem %s3789_s3, %s2602_s26 }
  0x3b   : > { %s3353_s17 = scalar_lea.vmem %s3790_s4, %s2434_s25  ;;  %s3358_s18 = scalar_lea.vmem %s3792_s5, %s2602_s26 }
  0x3c   : > { %3791 = sst [smem:[#allocation20_spill]] %s3353_s17  ;;  %s3363_s28 = scalar_lea.vmem %s3793_s6, %s2434_s25 }
  0x3d   : > { %s2605_s2 = sshll.u32 %s3328_s22, 6  ;;  %s810_s6 = scalar_lea.vmem %s3731_s12, %s3328_s22 }
  0x3e   : > { %s3369_s24 = scalar_lea.vmem %s3794_s7, %s2605_s2  ;;  %s3386_s5 = scalar_lea.vmem %s3797_s11, %s2605_s2 }
  0x3f   : > { %s3395_s0 = scalar_lea.vmem %s3732_s13, %s2605_s2  ;;  %s818_s26 = scalar_lea.vmem %s3733_s14, %s3328_s22 }
  0x40   : > { %s3798_s21 = sld [smem:[#allocation32_spill]]  ;;  %s3799_s11 = sld [smem:[#allocation33_spill]] }
  0x41   : > { %s3800_s16 = sld [smem:[#allocation8_spill]] }
  0x46   : > { %s821_s23 = scalar_lea.vmem %s3798_s21, %s3328_s22  ;;  %s824_s10 = scalar_lea.vmem %s3799_s11, %s3328_s22 }
  0x47   : > { %p2447_p0 = scmp.ne.s32.totalorder %s3800_s16, 0 }
  0x48   : > { %v830_v0 = vld [vmem:[%s761_s1] sm:$0xff] (!%p2447_p0) }
  0x49   : > { %829 = sbr.rel (%p2447_p0) target bundleno = 80 (0x50), region = 92  ;;  %831 = vst [vmem:[%s3409_s9] sm:$0xff] (!%p2447_p0), %v830_v0 }
  0x50 PF: > { %s3801_s2 = sld [smem:[#allocation18_spill]]  ;;  %v2979_v1 = vld [vmem:[%s3348_s20] sm:$0xff]   ;;  %v3159_v2 = vmov 0.0   ;;  %v2980_v3 = vld [vmem:[%s3348_s20 + $0x8] sm:$0xff]   ;;  %vm3160_vm0 = vmmov 0   ;;  %v2982_v6 = vld [vmem:[%s3348_s20 + $0x10] sm:$0xff]  }
  0x51   : > { %2718 = vmatprep.subr.bf16.mxu1 %v3159_v2  ;;  %2698 = vmatprep.subr.bf16.mxu0 %v3159_v2  ;;  %v2984_v8 = vld [vmem:[%s3348_s20 + $0x18] sm:$0xff]   ;;  %v2986_v10 = vld [vmem:[%s3348_s20 + $0x20] sm:$0xff]   ;;  %v2988_v11 = vld [vmem:[%s3348_s20 + $0x28] sm:$0xff]   ;;  %s3802_s7 = sld [smem:[#allocation20_spill]]  ;;  %s3803_s11 = sld [smem:[#allocation19_spill]]  ;;  %vm1169_vm1 = vcmask 523264  }
  0x52   : > { %2719 = vmatpush3.bf16.msra.mxu1 %v2979_v1  ;;  %2734 = vmatprep.mubr.msk.bf16.mxu1 %vm3160_vm0, %v3159_v2  ;;  %v2990_v14 = vld [vmem:[%s3348_s20 + $0x30] sm:$0xff]   ;;  %v2992_v16 = vld [vmem:[%s3348_s20 + $0x38] sm:$0xff]   ;;  %v3446_v17 = vld [vmem:[%s3409_s9] sm:$0xff]  ;;  %vm1216_vm2 = vcmask 64512   ;;  %vm1233_vm3 = vcmask 1043456   ;;  %s3807_s3 = sld [smem:[#allocation30_spill]] }
  0x53   : > { %2720 = vmatprep.subr.bf16.mxu1 %v3159_v2  ;;  %2714 = vmatprep.mubr.msk.bf16.mxu0 %vm3160_vm0, %v3159_v2  ;;  %v3453_v19 = vpack.c.bf16 %v3446_v17, %v3446_v17  ;;  %v2995_v35 = vld [vmem:[%s3358_s18] sm:$0xff]   ;;  %v2996_v36 = vld [vmem:[%s3358_s18 + $0x8] sm:$0xff]   ;;  %v2997_v37 = vld [vmem:[%s3358_s18 + $0x10] sm:$0xff]  }
  0x54   : > { %v2998_v38 = vld [vmem:[%s3358_s18 + $0x18] sm:$0xff]   ;;  %v2999_v39 = vld [vmem:[%s3358_s18 + $0x20] sm:$0xff]   ;;  %v3000_v40 = vld [vmem:[%s3358_s18 + $0x28] sm:$0xff]  }
  0x55   : > { %v3001_v41 = vld [vmem:[%s3358_s18 + $0x30] sm:$0xff]   ;;  %v3002_v42 = vld [vmem:[%s3358_s18 + $0x38] sm:$0xff]   ;;  %v3003_v54 = vld [vmem:[%s3348_s20 + $0x40] sm:$0xff]  }
  0x56   : > { %v2981_v4 = vld [vmem:[%s3801_s2] sm:$0xff]   ;;  %v2983_v5 = vld [vmem:[%s3801_s2 + $0x8] sm:$0xff]   ;;  %2721 = vmatpush3.bf16.msra.mxu1 %v2980_v3  ;;  %v2985_v7 = vld [vmem:[%s3801_s2 + $0x10] sm:$0xff]  }
  0x57   : > { %2699 = vmatpush3.bf16.msra.mxu0 %v2981_v4  ;;  %2722 = vmatprep.subr.bf16.mxu1 %v3159_v2  ;;  %v2987_v9 = vld [vmem:[%s3801_s2 + $0x18] sm:$0xff]   ;;  %v2989_v12 = vld [vmem:[%s3801_s2 + $0x20] sm:$0xff]   ;;  %v2991_v13 = vld [vmem:[%s3801_s2 + $0x28] sm:$0xff]  }
  0x58   : > { %2700 = vmatprep.subr.bf16.mxu0 %v3159_v2  ;;  %v2993_v15 = vld [vmem:[%s3801_s2 + $0x30] sm:$0xff]   ;;  %v2994_v18 = vld [vmem:[%s3801_s2 + $0x38] sm:$0xff]   ;;  %v2457_v20 = vld [vmem:[%s3802_s7] ss:$0 sm:$0xff]  ;;  %s3808_s4 = scalar_lea.vmem %s3807_s3, %s3328_s22 }
  0x59   : > { %v2448_v25 = vld [vmem:[%s3803_s11] ss:$0 sm:$0xff]  ;;  %v3004_v60 = vld [vmem:[%s3348_s20 + $0x48] sm:$0xff]   ;;  %v3005_v63 = vld [vmem:[%s3348_s20 + $0x50] sm:$0xff]  }
  0x5a   : > { %2723 = vmatpush3.bf16.msra.mxu1 %v2982_v6  ;;  %v2466_v57 = vld [vmem:[%s3363_s28] ss:$0 sm:$0xff]  ;;  %v3007_v0 = vld [vmem:[%s3348_s20 + $0x58] sm:$0xff]   ;;  %v3011_v3 = vld [vmem:[%s3348_s20 + $0x68] sm:$0xff]  }
  0x5b   : > { %2701 = vmatpush3.bf16.msra.mxu0 %v2983_v5  ;;  %2724 = vmatprep.subr.bf16.mxu1 %v3159_v2  ;;  %v3009_v1 = vld [vmem:[%s3348_s20 + $0x60] sm:$0xff]   ;;  %v3013_v4 = vld [vmem:[%s3348_s20 + $0x70] sm:$0xff]   ;;  %v3015_v5 = vld [vmem:[%s3348_s20 + $0x78] sm:$0xff]   ;;  %s3804_s20 = scalar_lea.vmem %s3727_s8, %s3328_s22 }
  0x5c   : > { %2702 = vmatprep.subr.bf16.mxu0 %v3159_v2 }
  0x5e   : > { %2725 = vmatpush3.bf16.msra.mxu1 %v2984_v8 }
  0x5f   : > { %2703 = vmatpush3.bf16.msra.mxu0 %v2985_v7  ;;  %2726 = vmatprep.subr.bf16.mxu1 %v3159_v2 }
  0x60   : > { %2704 = vmatprep.subr.bf16.mxu0 %v3159_v2 }
  0x62   : > { %2727 = vmatpush3.bf16.msra.mxu1 %v2986_v10 }
  0x63   : > { %2705 = vmatpush3.bf16.msra.mxu0 %v2987_v9  ;;  %2728 = vmatprep.subr.bf16.mxu1 %v3159_v2  ;;  %v3006_v9 = vld [vmem:[%s3801_s2 + $0x40] sm:$0xff]  }
  0x64   : > { %2706 = vmatprep.subr.bf16.mxu0 %v3159_v2 }
  0x66   : > { %2729 = vmatpush3.bf16.msra.mxu1 %v2988_v11  ;;  %v3008_v11 = vld [vmem:[%s3801_s2 + $0x48] sm:$0xff]  }
  0x67   : > { %2707 = vmatpush3.bf16.msra.mxu0 %v2989_v12  ;;  %2730 = vmatprep.subr.bf16.mxu1 %v3159_v2  ;;  %v3010_v12 = vld [vmem:[%s3801_s2 + $0x50] sm:$0xff]  }
  0x68   : > { %2708 = vmatprep.subr.bf16.mxu0 %v3159_v2 }
  0x6a   : > { %2731 = vmatpush3.bf16.msra.mxu1 %v2990_v14  ;;  %v3014_v14 = vld [vmem:[%s3801_s2 + $0x60] sm:$0xff]  }
  0x6b   : > { %2709 = vmatpush3.bf16.msra.mxu0 %v2991_v13  ;;  %2732 = vmatprep.subr.bf16.mxu1 %v3159_v2  ;;  %v3012_v13 = vld [vmem:[%s3801_s2 + $0x58] sm:$0xff]  }
  0x6c   : > { %2710 = vmatprep.subr.bf16.mxu0 %v3159_v2 }
  0x6e   : > { %2733 = vmatpush3.bf16.msra.mxu1 %v2992_v16  ;;  %v3017_v16 = vld [vmem:[%s3801_s2 + $0x70] sm:$0xff]  }
  0x6f   : > { %2711 = vmatpush3.bf16.msra.mxu0 %v2993_v15  ;;  %2758 = vmatprep.subr.bf16.mxu1 %v3159_v2  ;;  %v3016_v15 = vld [vmem:[%s3801_s2 + $0x68] sm:$0xff]  }
  0x70   : > { %2712 = vmatprep.subr.bf16.mxu0 %v3159_v2 }
  0x71   : > { %2735 = vmatmul.mubr.bf16.vlgmr.msra.gmra.mrb[0].mxu1 %v3453_v19 }
  0x72   : > { %2760 = vmatprep.mubr.msk.bf16.mxu1 %vm3160_vm0, %v3159_v2 }
  0x73   : > { %2713 = vmatpush3.bf16.msra.mxu0 %v2994_v18  ;;  %v3018_v18 = vld [vmem:[%s3801_s2 + $0x78] sm:$0xff]  }
  0x74   : > { %2738 = vmatprep.subr.bf16.mxu0 %v3159_v2 }
  0x76   : > { %2715 = vmatmul.mubr.bf16.vlgmr.msra.gmra.mrb[0].mxu0 %v3453_v19 }
  0x77   : > { %2754 = vmatprep.mubr.msk.bf16.mxu0 %vm3160_vm0, %v3159_v2  ;;  %2739 = vmatpush3.bf16.msra.mxu0 %v2995_v35 }
  0x78   : > { %2740 = vmatprep.subr.bf16.mxu0 %v3159_v2 }
  0x7b   : > { %2741 = vmatpush3.bf16.msra.mxu0 %v2996_v36 }
  0x7c   : > { %2742 = vmatprep.subr.bf16.mxu0 %v3159_v2 }
  0x7f   : > { %2743 = vmatpush3.bf16.msra.mxu0 %v2997_v37 }
  0x80   : > { %2744 = vmatprep.subr.bf16.mxu0 %v3159_v2 }
  0x83   : > { %2745 = vmatpush3.bf16.msra.mxu0 %v2998_v38 }
  0x84   : > { %2746 = vmatprep.subr.bf16.mxu0 %v3159_v2 }
  0x87   : > { %2747 = vmatpush3.bf16.msra.mxu0 %v2999_v39 }
  0x88   : > { %2748 = vmatprep.subr.bf16.mxu0 %v3159_v2 }
  0x8b   : > { %2749 = vmatpush3.bf16.msra.mxu0 %v3000_v40 }
  0x8c   : > { %2750 = vmatprep.subr.bf16.mxu0 %v3159_v2 }
  0x8f   : > { %2751 = vmatpush3.bf16.msra.mxu0 %v3001_v41 }
  0x90   : > { %2752 = vmatprep.subr.bf16.mxu0 %v3159_v2 }
  0x93   : > { %2753 = vmatpush3.bf16.msra.mxu0 %v3002_v42 }
  0x94   : > { %2790 = vmatprep.subr.bf16.mxu0 %v3159_v2 }
  0x96   : > { %2755 = vmatmul.mubr.bf16.vlgmr.msra.gmra.mrb[4].mxu0 %v3453_v19 }
  0x97   : > { %2806 = vmatprep.mubr.msk.bf16.mxu0 %vm3160_vm0, %v3159_v2  ;;  %2791 = vmatpush3.bf16.msra.mxu0 %v3003_v54 }
  0x98   : > { %2792 = vmatprep.subr.bf16.mxu0 %v3159_v2 }
  0x9b   : > { %2793 = vmatpush3.bf16.msra.mxu0 %v3004_v60 }
  0x9c   : > { %2794 = vmatprep.subr.bf16.mxu0 %v3159_v2 }
  0x9f   : > { %2795 = vmatpush3.bf16.msra.mxu0 %v3005_v63 }
  0xa0   : > { %2796 = vmatprep.subr.bf16.mxu0 %v3159_v2 }
  0xa3   : > { %2797 = vmatpush3.bf16.msra.mxu0 %v3007_v0 }
  0xa4   : > { %2798 = vmatprep.subr.bf16.mxu0 %v3159_v2 }
  0xa7   : > { %2799 = vmatpush3.bf16.msra.mxu0 %v3009_v1 }
  0xa8   : > { %2800 = vmatprep.subr.bf16.mxu0 %v3159_v2 }
  0xab   : > { %2801 = vmatpush3.bf16.msra.mxu0 %v3011_v3 }
  0xac   : > { %2802 = vmatprep.subr.bf16.mxu0 %v3159_v2 }
  0xaf   : > { %2803 = vmatpush3.bf16.msra.mxu0 %v3013_v4 }
  0xb0   : > { %2804 = vmatprep.subr.bf16.mxu0 %v3159_v2 }
  0xb3   : > { %2805 = vmatpush3.bf16.msra.mxu0 %v3015_v5 }
  0xb4   : > { %2830 = vmatprep.subr.bf16.mxu0 %v3159_v2 }
  0xb6   : > { %2807 = vmatmul.mubr.bf16.vlgmr.msra.gmra.mrb[8].mxu0 %v3453_v19 }
  0xb7   : > { %2832 = vmatprep.mubr.msk.bf16.mxu0 %vm3160_vm0, %v3159_v2 }
 0x144   : > { %v1050_v21 = vpop.f32.mrb[0].mxu1 }
 0x145   : > { %v1051_v22 = vadd.f32 %v2457_v20, %v1050_v21  ;;  %v2736_v23 = vpop.f32.mrb[1].mxu1  ;;  %v3019_v20 = vld [vmem:[%s3358_s18 + $0x40] sm:$0xff]   ;;  %v3020_v21 = vld [vmem:[%s3358_s18 + $0x48] sm:$0xff]  }
 0x146   : > { %v1053_v24 = vpop.f32.mrb[2].mxu1  ;;  %v3022_v23 = vld [vmem:[%s3358_s18 + $0x58] sm:$0xff]  }
 0x147   : > { %v1168_v27 = vpack.c.bf16 %v1051_v22, %v1051_v22  ;;  %v2737_v28 = vpop.f32.mrb[3].mxu1  ;;  %v3021_v22 = vld [vmem:[%s3358_s18 + $0x50] sm:$0xff]   ;;  %v3023_v24 = vld [vmem:[%s3358_s18 + $0x60] sm:$0xff]  }
 0x148   : > { %v3027_v28 = vld [vmem:[%s3369_s24] sm:$0xff]  }
 0x149   : > { %v939_v26 = vpop.f32.mrb[0].mxu0  ;;  %v1174_v31 = vsel %vm1169_vm1, %v1168_v27, 0  ;;  %v3026_v27 = vld [vmem:[%s3358_s18 + $0x78] sm:$0xff]  }
 0x14a   : > { %v2716_v29 = vpop.f32.mrb[1].mxu0  ;;  %v940_v32 = vadd.f32 %v2448_v25, %v939_v26  ;;  %2759 = vmatpush3.bf16.xpose.msra.mxu1 %v1174_v31  ;;  %v3024_v25 = vld [vmem:[%s3358_s18 + $0x68] sm:$0xff]   ;;  %v3025_v26 = vld [vmem:[%s3358_s18 + $0x70] sm:$0xff]   ;;  %v3030_v31 = vld [vmem:[%s3369_s24 + $0x18] sm:$0xff]  }
 0x14b   : > { %v942_v30 = vpop.f32.mrb[2].mxu0  ;;  %2764 = vmatprep.subr.bf16.mxu1 %v3159_v2  ;;  %v3028_v29 = vld [vmem:[%s3369_s24 + $0x8] sm:$0xff]  }
 0x14c   : > { %v2717_v33 = vpop.f32.mrb[3].mxu0  ;;  %v1167_v34 = vpack.c.bf16 %v940_v32, %v940_v32  ;;  %v3029_v30 = vld [vmem:[%s3369_s24 + $0x10] sm:$0xff]   ;;  %v2520_v32 = vld [vmem:[%s3802_s7 + $0x1] ss:$0 sm:$0xff] }
 0x151   : > { %2761 = vmatmul.mubr.msk.bf16.vlgmr.msra.gmra.mrb[4].mxu1 %vm1169_vm1, %v1167_v34 }
 0x152   : > { %2766 = vmatprep.mubr.msk.bf16.mxu1 %vm3160_vm0, %v3159_v2 }
 0x169   : > { %v1161_v53 = vpop.f32.mrb[4].mxu0 }
 0x16a   : > { %v2756_v55 = vpop.f32.mrb[5].mxu0  ;;  %v1162_v59 = vadd.f32 %v2466_v57, %v1161_v53 }
 0x16b   : > { %v1164_v56 = vpop.f32.mrb[6].mxu0 }
 0x16c   : > { %v2757_v58 = vpop.f32.mrb[7].mxu0  ;;  %v1229_v61 = vpack.c.bf16 %v1162_v59, %v1162_v59 }
 0x16e   : > { %v1235_v62 = vsel %vm1233_vm3, %v1229_v61, 0 }
 0x16f   : > { %2765 = vmatpush3.bf16.msra.mxu1 %v1235_v62 }
 0x170   : > { %2770 = vmatprep.subr.bf16.mxu1 %v3159_v2 }
 0x224   : > { %v1210_v43 = vpop.f32.mrb[4].mxu1 }
 0x225   : > { %v2762_v44 = vpop.f32.mrb[5].mxu1  ;;  %v1217_v45 = vsel %vm1216_vm2, %v1210_v43, -inf }
 0x226   : > { %1218 = vmax.xlane.f32.xlu0 %v1217_v45  ;;  %v1213_v46 = vpop.f32.mrb[6].mxu1  ;;  %v2494_v44 = vld [vmem:[%s3803_s11 + $0x1] ss:$0 sm:$0xff] }
 0x227   : > { %v2763_v47 = vpop.f32.mrb[7].mxu1 }
 0x2b3   : > { %v1219_v48 = vpop.xlane.xlu0 %1218 }
 0x2b4   : > { %v1220_v49 = vsub.f32 %v1210_v43, %v1219_v48 }
 0x2b6   : > { %v1221_v50 = vmul.f32 1.442695, %v1220_v49 }
 0x2b8   : > { %3051 = vpow2.f32 %v1221_v50 }
 0x2c2   : > { %v3052_v51 = vpop.eup %3051 }
 0x2c3   : > { %v1223_v52 = vsel %vm1216_vm2, %v3052_v51, 0.0 }
 0x2c4   : > { %1224 = vadd.xlane.f32.xlu0 %v1223_v52 }
 0x351   : > { %v1225_v6 = vpop.xlane.xlu0 %1224 }
 0x352   : > { %3053 = vrcp.f32 %v1225_v6 }
 0x35c   : > { %v3054_v7 = vpop.eup %3053 }
 0x35d   : > { %v1227_v8 = vmul.f32 %v3054_v7, %v3052_v51  ;;  %v2546_v51 = vld [vmem:[%s3363_s28 + $0x1] ss:$0 sm:$0xff]  ;;  %s3805_s28 = sld [smem:[#allocation29_spill]] }
 0x35f   : > { %v1228_v10 = vpack.c.bf16 %v1227_v8, %v1227_v8 }
 0x361   : > { %2767 = vmatmul.mubr.msk.bf16.vlgmr.msra.gmra.mrb[8].mxu1 %vm1216_vm2, %v1228_v10 }
 0x362   : > { %2771 = vmatpush3.bf16.msra.mxu1 %v3006_v9  ;;  %2786 = vmatprep.mubr.msk.bf16.mxu1 %vm3160_vm0, %v3159_v2 }
 0x363   : > { %2772 = vmatprep.subr.bf16.mxu1 %v3159_v2 }
 0x366   : > { %2773 = vmatpush3.bf16.msra.mxu1 %v3008_v11 }
 0x367   : > { %2774 = vmatprep.subr.bf16.mxu1 %v3159_v2 }
 0x36a   : > { %2775 = vmatpush3.bf16.msra.mxu1 %v3010_v12 }
 0x36b   : > { %2776 = vmatprep.subr.bf16.mxu1 %v3159_v2 }
 0x36e   : > { %2777 = vmatpush3.bf16.msra.mxu1 %v3012_v13  ;;  %v3031_v13 = vld [vmem:[%s3369_s24 + $0x20] sm:$0xff]  }
 0x36f   : > { %2778 = vmatprep.subr.bf16.mxu1 %v3159_v2 }
 0x372   : > { %2779 = vmatpush3.bf16.msra.mxu1 %v3014_v14 }
 0x373   : > { %2780 = vmatprep.subr.bf16.mxu1 %v3159_v2 }
 0x376   : > { %2781 = vmatpush3.bf16.msra.mxu1 %v3016_v15  ;;  %v3032_v15 = vld [vmem:[%s3369_s24 + $0x28] sm:$0xff]  }
 0x377   : > { %2782 = vmatprep.subr.bf16.mxu1 %v3159_v2 }
 0x37a   : > { %2783 = vmatpush3.bf16.msra.mxu1 %v3017_v16  ;;  %v3033_v16 = vld [vmem:[%s3369_s24 + $0x30] sm:$0xff]  }
 0x37b   : > { %2784 = vmatprep.subr.bf16.mxu1 %v3159_v2 }
 0x37e   : > { %2785 = vmatpush3.bf16.msra.mxu1 %v3018_v18  ;;  %v3034_v18 = vld [vmem:[%s3369_s24 + $0x38] sm:$0xff]   ;;  %s3806_s24 = scalar_lea.vmem %s3805_s28, %s3328_s22  ;;  %s3814_s28 = sld [smem:[#allocation34_spill]] }
 0x37f   : > { %2810 = vmatprep.subr.bf16.mxu1 %v3159_v2 }
 0x381   : > { %2787 = vmatmul.mubr.bf16.vlgmr.msra.gmra.mrb[12].mxu1 %v3453_v19 }
 0x382   : > { %2811 = vmatpush3.bf16.msra.mxu1 %v3019_v20  ;;  %2826 = vmatprep.mubr.msk.bf16.mxu1 %vm3160_vm0, %v3159_v2 }
 0x383   : > { %2812 = vmatprep.subr.bf16.mxu1 %v3159_v2 }
 0x384   : > { %s3815_s21 = smov %s3814_s28 }
 0x386   : > { %2813 = vmatpush3.bf16.msra.mxu1 %v3020_v21 }
 0x387   : > { %2814 = vmatprep.subr.bf16.mxu1 %v3159_v2 }
 0x38a   : > { %2815 = vmatpush3.bf16.msra.mxu1 %v3021_v22 }
 0x38b   : > { %2816 = vmatprep.subr.bf16.mxu1 %v3159_v2 }
 0x38e   : > { %2817 = vmatpush3.bf16.msra.mxu1 %v3022_v23 }
 0x38f   : > { %2818 = vmatprep.subr.bf16.mxu1 %v3159_v2 }
 0x392   : > { %2819 = vmatpush3.bf16.msra.mxu1 %v3023_v24 }
 0x393   : > { %2820 = vmatprep.subr.bf16.mxu1 %v3159_v2 }
 0x396   : > { %2821 = vmatpush3.bf16.msra.mxu1 %v3024_v25  ;;  %v3035_v25 = vld [vmem:[%s3386_s5] sm:$0xff]  }
 0x397   : > { %2822 = vmatprep.subr.bf16.mxu1 %v3159_v2 }
 0x39a   : > { %2823 = vmatpush3.bf16.msra.mxu1 %v3025_v26 }
 0x39b   : > { %2824 = vmatprep.subr.bf16.mxu1 %v3159_v2 }
 0x39e   : > { %2825 = vmatpush3.bf16.msra.mxu1 %v3026_v27  ;;  %v2575_v27 = vld [vmem:[%s3804_s20] ss:$0 sm:$0xff]  ;;  %s2184_s20 = sshll.u32 %s3409_s9, 4  ;;  %s3665_s20 = int_to_ptr.vmem [resolvable:$true] %s2184_s20 }
 0x39f   : > { %2854 = vmatprep.subr.bf16.mxu1 %v3159_v2  ;;  %s3063_s3 = scalar_lea.vmem %s3665_s20, 128 }
 0x3a0   : > { %p3064_p1 = scmp.ne.s32.totalorder %s3665_s20, %s3063_s3 }
 0x3a1   : > { %2827 = vmatmul.mubr.bf16.vlgmr.msra.gmra.mrb[16].mxu1 %v3453_v19  ;;  %v1506_v19 = vpop.f32.mrb[8].mxu0 }
 0x3a2   : > { %2855 = vmatpush3.bf16.msra.mxu1 %v3027_v28  ;;  %2862 = vmatprep.mubr.msk.bf16.mxu1 %vm3160_vm0, %v3159_v2  ;;  %v1507_v33 = vadd.f32 %v2520_v32, %v1506_v19  ;;  %v2808_v34 = vpop.f32.mrb[9].mxu0  ;;  %p3065_p2 = pnand %p3064_p1, %p3301_p3 }
 0x3a3   : > { %2856 = vmatprep.subr.bf16.mxu1 %v3159_v2  ;;  %v1509_v35 = vpop.f32.mrb[10].mxu0  ;;  %v3036_v34 = vld [vmem:[%s3386_s5 + $0x8] sm:$0xff]  }
 0x3a4   : > { %v1626_v36 = vpack.c.bf16 %v1507_v33, %v1507_v33  ;;  %v2809_v37 = vpop.f32.mrb[11].mxu0  ;;  %v3037_v35 = vld [vmem:[%s3386_s5 + $0x10] sm:$0xff]   ;;  %p3066_p4 = pneg %p3065_p2 }
 0x3a5   : > { %v3039_v37 = vld [vmem:[%s3386_s5 + $0x20] sm:$0xff]  }
 0x3a6   : > { %2857 = vmatpush3.bf16.msra.mxu1 %v3028_v29  ;;  %v1631_v38 = vsel %vm1169_vm1, %v1626_v36, 0  ;;  %v3038_v36 = vld [vmem:[%s3386_s5 + $0x18] sm:$0xff]  }
 0x3a7   : > { %2858 = vmatprep.subr.bf16.mxu1 %v3159_v2  ;;  %2831 = vmatpush3.bf16.xpose.msra.mxu0 %v1631_v38  ;;  %v3041_v38 = vld [vmem:[%s3386_s5 + $0x30] sm:$0xff]  }
 0x3a8   : > { %2836 = vmatprep.subr.bf16.mxu0 %v3159_v2 }
 0x3aa   : > { %2859 = vmatpush3.bf16.msra.mxu1 %v3029_v30 }
 0x3ab   : > { %2860 = vmatprep.subr.bf16.mxu1 %v3159_v2 }
 0x3ae   : > { %2861 = vmatpush3.bf16.msra.mxu1 %v3030_v31 }
 0x3af   : > { %2886 = vmatprep.subr.bf16.mxu1 %v3159_v2 }
 0x434   : > { %v1271_v39 = vpop.f32.mrb[8].mxu1 }
 0x435   : > { %v1277_v40 = vpack.c.bf16 %v1271_v39, %v1271_v39  ;;  %v2768_v41 = vpop.f32.mrb[9].mxu1  ;;  %v3042_v39 = vld [vmem:[%s3386_s5 + $0x38] sm:$0xff]  }
 0x436   : > { %v1274_v42 = vpop.f32.mrb[10].mxu1  ;;  %v3044_v41 = vld [vmem:[%s3395_s0 + $0x8] sm:$0xff]  }
 0x437   : > { %v2769_v43 = vpop.f32.mrb[11].mxu1  ;;  %2863 = vmatmul.mubr.msk.bf16.vlgmr.msra.gmra.mrb[20].mxu1 %vm1169_vm1, %v1277_v40  ;;  %v3043_v40 = vld [vmem:[%s3395_s0] sm:$0xff]   ;;  %v3045_v42 = vld [vmem:[%s3395_s0 + $0x10] sm:$0xff]  }
 0x438   : > { %2902 = vmatprep.mubr.msk.bf16.mxu1 %vm3160_vm0, %v3159_v2  ;;  %2887 = vmatpush3.bf16.msra.mxu1 %v3043_v40  ;;  %v3046_v43 = vld [vmem:[%s3395_s0 + $0x18] sm:$0xff]  }
 0x439   : > { %2888 = vmatprep.subr.bf16.mxu1 %v3159_v2 }
 0x43c   : > { %2889 = vmatpush3.bf16.msra.mxu1 %v3044_v41 }
 0x43d   : > { %2890 = vmatprep.subr.bf16.mxu1 %v3159_v2 }
 0x440   : > { %2891 = vmatpush3.bf16.msra.mxu1 %v3045_v42 }
 0x441   : > { %2892 = vmatprep.subr.bf16.mxu1 %v3159_v2 }
 0x444   : > { %2893 = vmatpush3.bf16.msra.mxu1 %v3046_v43 }
 0x445   : > { %2894 = vmatprep.subr.bf16.mxu1 %v3159_v2 }
 0x454   : > { %v1393_v45 = vpop.f32.mrb[12].mxu1 }
 0x455   : > { %v1394_v46 = vadd.f32 %v2494_v44, %v1393_v45  ;;  %v2788_v47 = vpop.f32.mrb[13].mxu1  ;;  %v3047_v44 = vld [vmem:[%s3395_s0 + $0x20] sm:$0xff]   ;;  %v3048_v45 = vld [vmem:[%s3395_s0 + $0x28] sm:$0xff]  }
 0x456   : > { %v1396_v48 = vpop.f32.mrb[14].mxu1  ;;  %2895 = vmatpush3.bf16.msra.mxu1 %v3047_v44 }
 0x457   : > { %v1625_v49 = vpack.c.bf16 %v1394_v46, %v1394_v46  ;;  %v2789_v50 = vpop.f32.mrb[15].mxu1  ;;  %2896 = vmatprep.subr.bf16.mxu1 %v3159_v2 }
 0x459   : > { %2833 = vmatmul.mubr.msk.bf16.vlgmr.msra.gmra.mrb[12].mxu0 %vm1169_vm1, %v1625_v49 }
 0x45a   : > { %2838 = vmatprep.mubr.msk.bf16.mxu0 %vm3160_vm0, %v3159_v2  ;;  %2897 = vmatpush3.bf16.msra.mxu1 %v3048_v45 }
 0x45b   : > { %2898 = vmatprep.subr.bf16.mxu1 %v3159_v2 }
 0x474   : > { %v1619_v52 = vpop.f32.mrb[16].mxu1 }
 0x475   : > { %v1620_v53 = vadd.f32 %v2546_v51, %v1619_v52  ;;  %v2828_v54 = vpop.f32.mrb[17].mxu1 }
 0x476   : > { %v1622_v55 = vpop.f32.mrb[18].mxu1 }
 0x477   : > { %v1685_v56 = vpack.c.bf16 %v1620_v53, %v1620_v53  ;;  %v2829_v57 = vpop.f32.mrb[19].mxu1  ;;  %v2576_v55 = vld [vmem:[%s3806_s24] ss:$0 sm:$0xff] }
 0x478   : > { %v2577_v57 = vld [vmem:[%s3808_s4] ss:$0 sm:$0xff] }
 0x479   : > { %v1690_v58 = vsel %vm1233_vm3, %v1685_v56, 0 }
 0x47a   : > { %2837 = vmatpush3.bf16.msra.mxu0 %v1690_v58 }
 0x47b   : > { %2842 = vmatprep.subr.bf16.mxu0 %v3159_v2 }
 0x50a   : > { %v1870_v59 = vpop.f32.mrb[20].mxu1 }
 0x50b   : > { %v2864_v60 = vpop.f32.mrb[21].mxu1 }
 0x50c   : > { %v1873_v61 = vpop.f32.mrb[22].mxu1 }
 0x50d   : > { %v2865_v62 = vpop.f32.mrb[23].mxu1  ;;  %v3049_v61 = vld [vmem:[%s3395_s0 + $0x30] sm:$0xff]  }
 0x50e   : > { %2899 = vmatpush3.bf16.msra.mxu1 %v3049_v61  ;;  %v3050_v62 = vld [vmem:[%s3395_s0 + $0x38] sm:$0xff]  }
 0x50f   : > { %2900 = vmatprep.subr.bf16.mxu1 %v3159_v2 }
 0x512   : > { %2901 = vmatpush3.bf16.msra.mxu1 %v3050_v62 }
 0x52c   : > { %v1667_v63 = vpop.f32.mrb[12].mxu0 }
 0x52d   : > { %v2834_v0 = vpop.f32.mrb[13].mxu0  ;;  %v1673_v1 = vsel %vm1216_vm2, %v1667_v63, -inf }
 0x52e   : > { %1674 = vmax.xlane.f32.xlu1 %v1673_v1  ;;  %v1670_v3 = vpop.f32.mrb[14].mxu0 }
 0x52f   : > { %v2835_v4 = vpop.f32.mrb[15].mxu0 }
 0x5bb   : > { %v1675_v5 = vpop.xlane.xlu1 %1674 }
 0x5bc   : > { %v1676_v6 = vsub.f32 %v1667_v63, %v1675_v5  ;;  %v2578_v63 = vld [vmem:[%s810_s6] ss:$0 sm:$0xff]  ;;  %s3809_s6 = sld [smem:[#allocation9_spill]] }
 0x5be   : > { %v1677_v7 = vmul.f32 1.442695, %v1676_v6 }
 0x5c0   : > { %3055 = vpow2.f32 %v1677_v7 }
 0x5c2   : > { %s2599_s1 = sshll.u32 %s3809_s6, 7 }
 0x5c3   : > { %s3663_s24 = scalar_lea.hbm %s3814_s28, %s2599_s1 }
 0x5ca   : > { %v3056_v8 = vpop.eup %3055 }
 0x5cb   : > { %v1679_v9 = vsel %vm1216_vm2, %v3056_v8, 0.0 }
 0x5cc   : > { %1680 = vadd.xlane.f32.xlu1 %v1679_v9 }
 0x659   : > { %v1681_v10 = vpop.xlane.xlu1 %1680 }
 0x65a   : > { %3057 = vrcp.f32 %v1681_v10 }
 0x664   : > { %v3058_v11 = vpop.eup %3057 }
 0x665   : > { %v1683_v12 = vmul.f32 %v3058_v11, %v3056_v8 }
 0x667   : > { %v1684_v14 = vpack.c.bf16 %v1683_v12, %v1683_v12 }
 0x669   : > { %2839 = vmatmul.mubr.msk.bf16.vlgmr.msra.gmra.mrb[16].mxu0 %vm1216_vm2, %v1684_v14 }
 0x66a   : > { %2843 = vmatpush3.bf16.msra.mxu0 %v3031_v13  ;;  %2850 = vmatprep.mubr.msk.bf16.mxu0 %vm3160_vm0, %v3159_v2 }
 0x66b   : > { %2844 = vmatprep.subr.bf16.mxu0 %v3159_v2 }
 0x66e   : > { %2845 = vmatpush3.bf16.msra.mxu0 %v3032_v15 }
 0x66f   : > { %2846 = vmatprep.subr.bf16.mxu0 %v3159_v2 }
 0x672   : > { %2847 = vmatpush3.bf16.msra.mxu0 %v3033_v16 }
 0x673   : > { %2848 = vmatprep.subr.bf16.mxu0 %v3159_v2 }
 0x676   : > { %2849 = vmatpush3.bf16.msra.mxu0 %v3034_v18 }
 0x677   : > { %2866 = vmatprep.subr.bf16.mxu0 %v3159_v2 }
 0x73c   : > { %v1726_v20 = vpop.f32.mrb[16].mxu0 }
 0x73d   : > { %v1732_v21 = vpack.c.bf16 %v1726_v20, %v1726_v20  ;;  %v2840_v22 = vpop.f32.mrb[17].mxu0 }
 0x73e   : > { %v1729_v23 = vpop.f32.mrb[18].mxu0 }
 0x73f   : > { %v2841_v24 = vpop.f32.mrb[19].mxu0  ;;  %2851 = vmatmul.mubr.msk.bf16.vlgmr.msra.gmra.mrb[20].mxu0 %vm1169_vm1, %v1732_v21 }
 0x740   : > { %2882 = vmatprep.mubr.msk.bf16.mxu0 %vm3160_vm0, %v3159_v2  ;;  %2867 = vmatpush3.bf16.msra.mxu0 %v3035_v25 }
 0x741   : > { %2868 = vmatprep.subr.bf16.mxu0 %v3159_v2 }
 0x744   : > { %2869 = vmatpush3.bf16.msra.mxu0 %v3036_v34 }
 0x745   : > { %2870 = vmatprep.subr.bf16.mxu0 %v3159_v2 }
 0x748   : > { %2871 = vmatpush3.bf16.msra.mxu0 %v3037_v35 }
 0x749   : > { %2872 = vmatprep.subr.bf16.mxu0 %v3159_v2 }
 0x74c   : > { %2873 = vmatpush3.bf16.msra.mxu0 %v3038_v36 }
 0x74d   : > { %2874 = vmatprep.subr.bf16.mxu0 %v3159_v2 }
 0x750   : > { %2875 = vmatpush3.bf16.msra.mxu0 %v3039_v37 }
 0x751   : > { %2876 = vmatprep.subr.bf16.mxu0 %v3159_v2 }
 0x812   : > { %v1803_v26 = vpop.f32.mrb[20].mxu0 }
 0x813   : > { %v1871_v28 = vadd.f32 %v1870_v59, %v1803_v26  ;;  %v2852_v29 = vpop.f32.mrb[21].mxu0  ;;  %v2596_v26 = vld [vmem:[%s821_s23] ss:$0 sm:$0xff] }
 0x814   : > { %v1806_v30 = vpop.f32.mrb[22].mxu0 }
 0x815   : > { %v1883_v31 = vadd.f32 %v2575_v27, %v1871_v28  ;;  %v2853_v32 = vpop.f32.mrb[23].mxu0  ;;  %v2597_v28 = vld [vmem:[%s824_s10] ss:$0 sm:$0xff]  ;;  %s3161_s10 = smov [#allocation2]  }
 0x816   : > { %s3067_s22 = sshll.u32 %s3161_s10, 4  ;;  %s3068_s22 = int_to_ptr.vmem [resolvable:$false] %s3067_s22 }
 0x817   : > { %v1884_v19 = vadd.f32 %v1883_v31, %v3446_v17  ;;  %v3040_v17 = vld [vmem:[%s3386_s5 + $0x28] sm:$0xff]   ;;  %s3069_s4 = scalar_lea.vmem %s3068_s22, 256  ;;  %p3070_p5 = scmp.lt.s32.totalorder %s3665_s20, %s3068_s22 }
 0x818   : > { %2877 = vmatpush3.bf16.msra.mxu0 %v3040_v17  ;;  %p3071_p6 = scmp.lt.s32.totalorder %s3069_s4, %s3063_s3 }
 0x819   : > { %1885 = vadd.xlane.f32.xlu0 %v1884_v19  ;;  %v1888_v33 = vmul.f32 %v1884_v19, %v1884_v19  ;;  %2878 = vmatprep.subr.bf16.mxu0 %v3159_v2 }
 0x81a   : > { %p3072_p7 = por %p3071_p6, %p3070_p5 }
 0x81b   : > { %1889 = vadd.xlane.f32.xlu1 %v1888_v33 }
 0x81c   : > { %2879 = vmatpush3.bf16.msra.mxu0 %v3041_v38  ;;  %p3073_p8 = pnand %p3072_p7, %p3066_p4 }
 0x81d   : > { %2880 = vmatprep.subr.bf16.mxu0 %v3159_v2  ;;  %v2587_v2 = vld [vmem:[%s818_s26] ss:$0 sm:$0xff]  ;;  %s3810_s26 = sld [smem:[#allocation6_spill]] }
 0x820   : > { %2881 = vmatpush3.bf16.msra.mxu0 %v3042_v39 }
 0x823   : > { %s3816_s23 = sand.u32 1, %s3810_s26  }
 0x824   : > { %s2171_s15 = scalar_lea.sflag [#allocation3], %s3816_s23 }
 0x8a6   : > { %v1886_v46 = vpop.xlane.xlu0 %1885 }
 0x8a7   : > { %v1887_v47 = vmul.f32 0.03125, %v1886_v46 }
 0x8a8   : > { %v1890_v48 = vpop.xlane.xlu1 %1889 }
 0x8a9   : > { %v1892_v49 = vmul.f32 %v1887_v47, %v1887_v47  ;;  %v1891_v50 = vmul.f32 0.03125, %v1890_v48  ;;  %v1894_v53 = vsub.f32 %v1884_v19, %v1887_v47 }
 0x8ab   : > { %v1893_v51 = vsub.f32 %v1891_v50, %v1892_v49 }
 0x8ad   : > { %v1895_v52 = vadd.f32 1e-05, %v1893_v51 }
 0x8af   : > { %3059 = vrsqrt.f32 %v1895_v52 }
 0x8b9   : > { %v3060_v54 = vpop.eup %3059 }
 0x8ba   : > { %v1897_v56 = vmul.f32 %v3060_v54, %v1894_v53 }
 0x8bc   : > { %v1905_v58 = vmul.f32 %v2576_v55, %v1897_v56 }
 0x8be   : > { %v1913_v59 = vadd.f32 %v2577_v57, %v1905_v58 }
 0x8c0   : > { %v1914_v60 = vpack.c.bf16 %v1913_v59, %v1913_v59 }
 0x8c2   : > { %2883 = vmatmul.mubr.bf16.vlgmr.msra.gmra.mrb[24].mxu0 %v1914_v60 }
 0x995   : > { %v2020_v0 = vpop.f32.mrb[24].mxu0 }
 0x996   : > { %v2021_v1 = vadd.f32 %v2578_v63, %v2020_v0  ;;  %v2884_v3 = vpop.f32.mrb[25].mxu0 }
 0x997   : > { %v2023_v4 = vpop.f32.mrb[26].mxu0 }
 0x998   : > { %v2026_v5 = vmax.f32 %v2021_v1, 0.0  ;;  %v2885_v6 = vpop.f32.mrb[27].mxu0 }
 0x99a   : > { %v2027_v7 = vpack.c.bf16 %v2026_v5, %v2026_v5 }
 0x99c   : > { %2903 = vmatmul.mubr.bf16.vlgmr.msra.gmra.mrb[24].mxu1 %v2027_v7 }
 0xa6f   : > { %v2133_v8 = vpop.f32.mrb[24].mxu1 }
 0xa70   : > { %v2134_v9 = vadd.f32 %v2587_v2, %v2133_v8  ;;  %v2904_v10 = vpop.f32.mrb[25].mxu1 }
 0xa71   : > { %v2136_v11 = vpop.f32.mrb[26].mxu1 }
 0xa72   : > { %v2139_v12 = vadd.f32 %v2134_v9, %v1913_v59  ;;  %v2905_v13 = vpop.f32.mrb[27].mxu1 }
 0xa74   : > { %2140 = vadd.xlane.f32.xlu0 %v2139_v12  ;;  %v2143_v14 = vmul.f32 %v2139_v12, %v2139_v12 }
 0xa76   : > { %2144 = vadd.xlane.f32.xlu1 %v2143_v14 }
 0xb01   : > { %v2141_v15 = vpop.xlane.xlu0 %2140 }
 0xb02   : > { %v2142_v16 = vmul.f32 0.03125, %v2141_v15 }
 0xb03   : > { %v2145_v18 = vpop.xlane.xlu1 %2144 }
 0xb04   : > { %v2147_v20 = vmul.f32 %v2142_v16, %v2142_v16  ;;  %v2146_v21 = vmul.f32 0.03125, %v2145_v18  ;;  %v2149_v24 = vsub.f32 %v2139_v12, %v2142_v16 }
 0xb06   : > { %v2148_v22 = vsub.f32 %v2146_v21, %v2147_v20 }
 0xb08   : > { %v2150_v23 = vadd.f32 1e-05, %v2148_v22 }
 0xb0a   : > { %3061 = vrsqrt.f32 %v2150_v23 }
 0xb14   : > { %v3062_v25 = vpop.eup %3061 }
 0xb15   : > { %v2152_v27 = vmul.f32 %v3062_v25, %v2149_v24 }
 0xb17   : > { %v2160_v29 = vmul.f32 %v2596_v26, %v2152_v27 }
 0xb19   : > { %v2168_v30 = vadd.f32 %v2597_v28, %v2160_v29 }
 0xb1b   : > { %2169 = vst [vmem:[%s3409_s9] sm:$0xff] %v2168_v30 }
 0xb1c   : > { %3076 = shalt.err (!%p3073_p8)
}
 0xb1d   : > { %s3077_s9 = scalar_lea.hbm %s3663_s24, 128  ;;  %s3081_s19 = scalar_lea.hbm %s3815_s21, 256 }
 0xb1e   : > { %p3078_p10 = scmp.ne.s32.totalorder %s3663_s24, %s3077_s9  ;;  %p3082_p13 = scmp.lt.u32.totalorder %s3663_s24, %s3815_s21 }
 0xb1f   : > { %p3083_p0 = scmp.lt.u32.totalorder %s3081_s19, %s3077_s9  ;;  %p3085_p2 = scmp.lt.u32.totalorder %s3077_s9, %s3663_s24 }
 0xb20   : > { %p3079_p11 = pnand %p3078_p10, %p3301_p3 }
 0xb21   : > { %p3084_p1 = por %p3083_p0, %p3082_p13 }
 0xb22   : > { %p3080_p12 = pneg %p3079_p11 }
 0xb23   : > { %p3086_p4 = por %p3085_p2, %p3084_p1 }
 0xb25   : > { %p3087_p5 = pnand %p3086_p4, %p3080_p12 }
 0xb27   : > { %3090 = shalt.err (!%p3087_p5)
}
 0xb28   : > { %2906 = dma.vmem_to_hbm [thread:$0]  (%p3301_p3), %s3665_s20, 128, %s3663_s24, %s2171_s15  }
 0xb29 PF: > { %s3817_s26 = sld [smem:[#allocation12_spill]]  ;;  %s3818_s27 = sld [smem:[#allocation5_spill]] }
 0xb2f   : > { %p2912_p6 = scmp.ge.s32.totalorder %s3817_s26, 2  ;;  %s2196_s2 = sand.u32 1, %s3818_s27  }
 0xb30   : > { %s2197_s7 = scalar_lea.sflag [#allocation3], %s2196_s2 }
 0xb31   : > { %p2909_p7 = pnand %p2912_p6, %p3311_p9 }
 0xb33   : > { %3124 = dma.done.wait (!%p2909_p7), %s2197_s7, 128  }
 0xb34   : > { %3126 = vsyncadd (!%p2909_p7), %s2197_s7, 4294967168  ;;  %s30_s30 = sadd.s32 1, %s3817_s26   ;;  %s3820_s24 = sld [smem:[#allocation6_spill]] }
 0xb35   : > { %p27_p8 = scmp.ge.s32.totalorder %s30_s30, 6   ;;  %s3821_s25 = sld [smem:[#allocation7_spill]] }
 0xb36   : > { %s3822_s26 = sld [smem:[#allocation17_spill]]  ;;  %s3823_s27 = sld [smem:[#allocation10_spill]] }
 0xb37   : > { %s3824_s28 = sld [smem:[#allocation11_spill]]  ;;  %s3825_s29 = sld [smem:[#allocation13_spill]] }
 0xb38   : > { %s3826_s0 = sld [smem:[#allocation15_spill]]  ;;  %29 = sbr.rel (!%p27_p8) target bundleno = 20 (0x14), region = 182 }
 0xb3f   :  { %2202 = vsyncpa [#allocation3], 1 }
 0xb40   :  { %2204 = vsyncpa [#allocation3 + $0x1], 1 }

</bundles_post_ra>
